<compile_context>
chip_gen: v5e
topology: v5e:2x2
jax: 0.10.0
libtpu: 0.0.40
codegen_flags: <defaults>
</compile_context>

<pallas_src>
import jax
import jax.numpy as jnp
from jax.experimental import pallas as pl
from jax.experimental.pallas import tpu as pltpu


def ln_linear_kernel(x_ref, gamma_ref, beta_ref, w_ref, b_ref, o_ref, y_ref):
    # Normalize once per row tile (first Cout step) and cache in VMEM (bf16).
    @pl.when(pl.program_id(1) == 0)
    def _():
        x = x_ref[...]
        if x.dtype != jnp.float32:          # static at trace time; no-op for f32
            x = x.astype(jnp.float32)
        # Single fused pass: mean and mean-of-squares, var = E[x^2] - E[x]^2.
        mean = jnp.mean(x, axis=-1, keepdims=True)
        m2 = jnp.mean(x * x, axis=-1, keepdims=True)
        var = jnp.maximum(m2 - mean * mean, 0.0)
        xn = (x - mean) * jax.lax.rsqrt(var + 1e-5)
        y = xn * gamma_ref[...] + beta_ref[...]
        y_ref[...] = y.astype(y_ref.dtype)

    # bf16 x bf16 -> f32 MXU matmul for this Cout tile, reusing cached LN output.
    out = jnp.dot(y_ref[...], w_ref[...], preferred_element_type=jnp.float32)
    o_ref[...] = (out + b_ref[...]).astype(o_ref.dtype)


def layernorm_linear(x_nhwc, gamma, beta, weight, bias, *, tm=112, tn=512):
    """x_nhwc: [N, H, W, Cin]; weight: [Cin, Cout]; gamma/beta: [Cin]; bias: [Cout]."""
    N, H, W, Cin = x_nhwc.shape
    Cout = weight.shape[1]
    R = N * H * W

    assert tm % 8 == 0, "row tile must be a multiple of 8 sublanes"
    assert Cin % 128 == 0, "Cin must be lane-aligned"
    if Cout % tn != 0:
        tn = Cout  # fallback: single Cout tile
    assert Cout % tn == 0

    # Pad rows so every tile is full (padded zero rows are discarded at the end).
    R_pad = pl.cdiv(R, tm) * tm

    x2d = x_nhwc.reshape(R, Cin)
    if R_pad != R:
        x2d = jnp.pad(x2d, ((0, R_pad - R), (0, 0)))

    gamma2d = gamma.reshape(1, Cin).astype(jnp.float32)
    beta2d = beta.reshape(1, Cin).astype(jnp.float32)
    bias2d = bias.reshape(1, Cout).astype(jnp.float32)
    w_bf16 = weight.astype(jnp.bfloat16)   # halve weight HBM traffic, bf16 MXU path

    grid = (R_pad // tm, Cout // tn)

    out2d = pl.pallas_call(
        ln_linear_kernel,
        out_shape=jax.ShapeDtypeStruct((R_pad, Cout), x_nhwc.dtype),
        grid_spec=pltpu.PrefetchScalarGridSpec(
            num_scalar_prefetch=0,
            grid=grid,
            in_specs=[
                pl.BlockSpec((tm, Cin), lambda i, j: (i, 0)),   # x rows; resident over j
                pl.BlockSpec((1, Cin), lambda i, j: (0, 0)),    # gamma (resident)
                pl.BlockSpec((1, Cin), lambda i, j: (0, 0)),    # beta (resident)
                pl.BlockSpec((Cin, tn), lambda i, j: (0, j)),   # bf16 weight Cout tile
                pl.BlockSpec((1, tn), lambda i, j: (0, j)),     # bias Cout tile
            ],
            out_specs=pl.BlockSpec((tm, tn), lambda i, j: (i, j)),
            scratch_shapes=[pltpu.VMEM((tm, Cin), jnp.bfloat16)],  # cached LN output
        ),
        compiler_params=pltpu.CompilerParams(
            dimension_semantics=("parallel", "arbitrary")),       # v7x: shard rows over TCs
    )(x2d, gamma2d, beta2d, w_bf16, bias2d)

    return out2d[:R].reshape(N, H, W, Cout)


if __name__ == "__main__":
    key = jax.random.PRNGKey(0)
    k_x, k_w, k_b, k_g, k_bt = jax.random.split(key, 5)

    # Shapes implied by the module forward: x195 is [1, 14, 14, 384], Linear 384->1536.
    N, H, W, Cin, Cout = 1, 14, 14, 384, 1536

    x = jax.random.normal(k_x, (N, H, W, Cin), dtype=jnp.float32)

    # LayerNorm affine params (perturbed from PyTorch init so the affine path matters).
    gamma = jnp.ones((Cin,), jnp.float32) + 0.01 * jax.random.normal(k_g, (Cin,))
    beta = 0.01 * jax.random.normal(k_bt, (Cin,), dtype=jnp.float32)

    # Linear params. PyTorch stores weight as [Cout, Cin]; kernel takes [Cin, Cout].
    bound = 1.0 / (Cin ** 0.5)
    w_torch = jax.random.uniform(k_w, (Cout, Cin), jnp.float32, -bound, bound)
    b = jax.random.uniform(k_b, (Cout,), jnp.float32, -bound, bound)
    w = w_torch.T

    out = layernorm_linear(x, gamma, beta, w, b)
    out = jax.block_until_ready(out)

    # Reference check in plain f32 JAX (kernel matmul is bf16 -> looser tolerance).
    mean = jnp.mean(x, axis=-1, keepdims=True)
    var = jnp.mean(jnp.square(x - mean), axis=-1, keepdims=True)
    xn = (x - mean) / jnp.sqrt(var + 1e-5)
    ref = (xn * gamma + beta) @ w + b

    assert out.shape == (N, H, W, Cout)
    assert jnp.allclose(out, ref, atol=3e-2, rtol=3e-2)

    print("KERNEL_OK")
</pallas_src>

<mosaic_0001>
module attributes {stable_mosaic.version = 11 : i64} {
  func.func @ln_linear_kernel(%arg0: i32, %arg1: i32, %arg2: memref<112x384xf32, #tpu.memory_space<vmem>>, %arg3: memref<1x384xf32, #tpu.memory_space<vmem>>, %arg4: memref<1x384xf32, #tpu.memory_space<vmem>>, %arg5: memref<384x512xbf16, #tpu.memory_space<vmem>>, %arg6: memref<1x512xf32, #tpu.memory_space<vmem>>, %arg7: memref<112x512xf32, #tpu.memory_space<vmem>>, %arg8: memref<112x384xbf16, #tpu.memory_space<vmem>>) attributes {dimension_semantics = [#tpu.dimension_semantics<parallel>, #tpu.dimension_semantics<arbitrary>], iteration_bounds = array<i64: 2, 3>, scalar_prefetch = 0 : i64, scratch_operands = 1 : i64, tpu.core_type = #tpu.core_type<tc>, window_params = [{transform_indices = @transform_0, window_bounds = array<i64: 112, 384>}, {pipeline_mode = #tpu.pipeline_mode<synchronous>, transform_indices = @transform_1, window_bounds = array<i64: 1, 384>}, {pipeline_mode = #tpu.pipeline_mode<synchronous>, transform_indices = @transform_2, window_bounds = array<i64: 1, 384>}, {transform_indices = @transform_3, window_bounds = array<i64: 384, 512>}, {transform_indices = @transform_4, window_bounds = array<i64: 1, 512>}, {transform_indices = @transform_5, window_bounds = array<i64: 112, 512>}]} {
    %c0_i32 = arith.constant 0 : i32
    %0 = arith.cmpi eq, %arg1, %c0_i32 : i32
    %1 = arith.extui %0 : i1 to i32
    %c0_i32_0 = arith.constant 0 : i32
    %2 = arith.cmpi ne, %1, %c0_i32_0 : i32
    scf.if %2 {
      %c0_8 = arith.constant 0 : index
      %c0_9 = arith.constant 0 : index
      %10 = vector.load %arg2[%c0_8, %c0_9] : memref<112x384xf32, #tpu.memory_space<vmem>>, vector<112x384xf32>
      %cst_10 = arith.constant dense<0.000000e+00> : vector<112xf32>
      %11 = vector.multi_reduction <add>, %10, %cst_10 [1] : vector<112x384xf32> to vector<112xf32>
      %12 = vector.shape_cast %11 : vector<112xf32> to vector<112x1xf32>
      %cst_11 = arith.constant 3.840000e+02 : f32
      %13 = vector.broadcast %cst_11 : f32 to vector<112x1xf32>
      %14 = arith.divf %12, %13 : vector<112x1xf32>
      %15 = arith.mulf %10, %10 : vector<112x384xf32>
      %cst_12 = arith.constant dense<0.000000e+00> : vector<112xf32>
      %16 = vector.multi_reduction <add>, %15, %cst_12 [1] : vector<112x384xf32> to vector<112xf32>
      %17 = vector.shape_cast %16 : vector<112xf32> to vector<112x1xf32>
      %cst_13 = arith.constant 3.840000e+02 : f32
      %18 = vector.broadcast %cst_13 : f32 to vector<112x1xf32>
      %19 = arith.divf %17, %18 : vector<112x1xf32>
      %20 = arith.mulf %14, %14 : vector<112x1xf32>
      %21 = arith.subf %19, %20 : vector<112x1xf32>
      %cst_14 = arith.constant 0.000000e+00 : f32
      %22 = vector.broadcast %cst_14 : f32 to vector<112x1xf32>
      %23 = arith.maximumf %21, %22 : vector<112x1xf32>
      %24 = vector.broadcast %14 : vector<112x1xf32> to vector<112x384xf32>
      %25 = arith.subf %10, %24 : vector<112x384xf32>
      %cst_15 = arith.constant 9.99999974E-6 : f32
      %26 = vector.broadcast %cst_15 : f32 to vector<112x1xf32>
      %27 = arith.addf %23, %26 : vector<112x1xf32>
      %28 = math.rsqrt %27 : vector<112x1xf32>
      %29 = vector.broadcast %28 : vector<112x1xf32> to vector<112x384xf32>
      %30 = arith.mulf %25, %29 : vector<112x384xf32>
      %c0_16 = arith.constant 0 : index
      %c0_17 = arith.constant 0 : index
      %31 = vector.load %arg3[%c0_16, %c0_17] : memref<1x384xf32, #tpu.memory_space<vmem>>, vector<1x384xf32>
      %32 = vector.broadcast %31 : vector<1x384xf32> to vector<112x384xf32>
      %33 = arith.mulf %30, %32 : vector<112x384xf32>
      %c0_18 = arith.constant 0 : index
      %c0_19 = arith.constant 0 : index
      %34 = vector.load %arg4[%c0_18, %c0_19] : memref<1x384xf32, #tpu.memory_space<vmem>>, vector<1x384xf32>
      %35 = vector.broadcast %34 : vector<1x384xf32> to vector<112x384xf32>
      %36 = arith.addf %33, %35 : vector<112x384xf32>
      %37 = arith.truncf %36 : vector<112x384xf32> to vector<112x384xbf16>
      %c0_20 = arith.constant 0 : index
      %c0_21 = arith.constant 0 : index
      %38 = vector.load %arg8[%c0_20, %c0_21] : memref<112x384xbf16, #tpu.memory_space<vmem>>, vector<112x384xbf16>
      tpu.vector_store %arg8[%c0_20, %c0_21], %37 {strides = array<i32>} : memref<112x384xbf16, #tpu.memory_space<vmem>>, vector<112x384xbf16>,
    } else {
    }
    %c0 = arith.constant 0 : index
    %c0_1 = arith.constant 0 : index
    %3 = vector.load %arg8[%c0, %c0_1] : memref<112x384xbf16, #tpu.memory_space<vmem>>, vector<112x384xbf16>
    %c0_2 = arith.constant 0 : index
    %c0_3 = arith.constant 0 : index
    %4 = vector.load %arg5[%c0_2, %c0_3] : memref<384x512xbf16, #tpu.memory_space<vmem>>, vector<384x512xbf16>
    %cst = arith.constant dense<0.000000e+00> : vector<112x512xf32>
    %5 = tpu.matmul %3, %4, %cst {dimension_numbers = #tpu.dot_dimension_numbers<[1], [0], [0], [1], [0, 0, 1, 1], [], []>} : vector<112x384xbf16>, vector<384x512xbf16>, vector<112x512xf32> -> vector<112x512xf32>
    %c0_4 = arith.constant 0 : index
    %c0_5 = arith.constant 0 : index
    %6 = vector.load %arg6[%c0_4, %c0_5] : memref<1x512xf32, #tpu.memory_space<vmem>>, vector<1x512xf32>
    %7 = vector.broadcast %6 : vector<1x512xf32> to vector<112x512xf32>
    %8 = arith.addf %5, %7 : vector<112x512xf32>
    %c0_6 = arith.constant 0 : index
    %c0_7 = arith.constant 0 : index
    %9 = vector.load %arg7[%c0_6, %c0_7] : memref<112x512xf32, #tpu.memory_space<vmem>>, vector<112x512xf32>
    tpu.vector_store %arg7[%c0_6, %c0_7], %8 {strides = array<i32>} : memref<112x512xf32, #tpu.memory_space<vmem>>, vector<112x512xf32>,
    return
  }
  func.func @transform_0(%arg0: i32, %arg1: i32) -> (i32, i32) {
    %c0_i32 = arith.constant 0 : i32
    %c0_i32_0 = arith.constant 0 : i32
    return %arg0, %c0_i32 : i32, i32
  }
  func.func @transform_1(%arg0: i32, %arg1: i32) -> (i32, i32) {
    %c0_i32 = arith.constant 0 : i32
    %c0_i32_0 = arith.constant 0 : i32
    %c0_i32_1 = arith.constant 0 : i32
    return %c0_i32, %c0_i32_0 : i32, i32
  }
  func.func @transform_2(%arg0: i32, %arg1: i32) -> (i32, i32) {
    %c0_i32 = arith.constant 0 : i32
    %c0_i32_0 = arith.constant 0 : i32
    %c0_i32_1 = arith.constant 0 : i32
    return %c0_i32, %c0_i32_0 : i32, i32
  }
  func.func @transform_3(%arg0: i32, %arg1: i32) -> (i32, i32) {
    %c0_i32 = arith.constant 0 : i32
    %c0_i32_0 = arith.constant 0 : i32
    return %c0_i32, %arg1 : i32, i32
  }
  func.func @transform_4(%arg0: i32, %arg1: i32) -> (i32, i32) {
    %c0_i32 = arith.constant 0 : i32
    %c0_i32_0 = arith.constant 0 : i32
    return %c0_i32, %arg1 : i32, i32
  }
  func.func @transform_5(%arg0: i32, %arg1: i32) -> (i32, i32) {
    %c0_i32 = arith.constant 0 : i32
    return %arg0, %arg1 : i32, i32
  }
}

</mosaic_0001>

<bundles_post_ra>
// kernel: tpu_custom_call.1
= control target key start
LH: loop header
LB: loop body
LE: loop exit
PB: predicated region body
PF: predicated region fallthrough
CT: control target
= control target key end

     0   :  { %s5319_s0 = inlined_call_operand.hbm [shape: f32[224,384], index: 0, kind: input, shape index: {}]   ;;  %s5320_s1 = inlined_call_operand.hbm [shape: f32[1,384], index: 1, kind: input, shape index: {}]   ;;  %s5321_s2 = inlined_call_operand.hbm [shape: f32[1,384], index: 2, kind: input, shape index: {}]   ;;  %s5322_s3 = inlined_call_operand.hbm [shape: bf16[384,1536], index: 3, kind: input, shape index: {}]   ;;  %s5323_s4 = inlined_call_operand.hbm [shape: f32[1,1536], index: 4, kind: input, shape index: {}]   ;;  %s5324_s5 = inlined_call_operand.hbm [shape: f32[224,1536], index: 5, kind: output, shape index: {}]  }
   0x1   :  { %5372 = sst [smem:[#allocation54_spill]] %s5320_s1 }
   0x2   :  { %5373 = sst [smem:[#allocation55_spill]] %s5321_s2 }
   0x3   :  { %5374 = sst [smem:[#allocation56_spill]] %s5322_s3 }
   0x4   :  { %5375 = sst [smem:[#allocation57_spill]] %s5324_s5 }
   0x5   :  { %10 = vsyncpa [#allocation4], 0 }
   0x6   :  { %12 = vsyncpa [#allocation4 + $0x1], 0 }
   0x7   :  { %13 = vsyncpa [#allocation7], 0 }
   0x8   :  { %14 = vsyncpa [#allocation10], 0 }
   0x9   :  { %16 = vsyncpa [#allocation10 + $0x1], 0 }
   0xa   :  { %17 = vsyncpa [#allocation5], 0 }
   0xb   :  { %19 = vsyncpa [#allocation5 + $0x1], 0  ;;  %s3685_s18 = smov 0   ;;  %s3687_s19 = smov 0  }
   0xc   :  { %s3689_s20 = smov 0   ;;  %s3691_s21 = smov 0  }
   0xd   :  { %s3693_s22 = smov 0   ;;  %s3695_s23 = smov 0  }
   0xe   :  { %s3697_s24 = smov 0   ;;  %s3699_s25 = smov 0  }
   0xf   :  { %s3701_s26 = smov 0   ;;  %s3703_s27 = smov 0  }
  0x10   :  { %s3705_s28 = smov 0   ;;  %s3707_s29 = smov 0  }
  0x11   :  { %s3709_s30 = smov 0   ;;  %s3711_s6 = smov 0  }
  0x12 LB: > { %5376 = sst [smem:[#allocation17_spill]] %s3590_s18  ;;  %s3752_s7 = sadd.s32 4294967295, %s3642_s6   ;;  %s3642_s6 = sphi %s3711_s6, %s25_s6   ;;  %s3638_s30 = sphi %s3709_s30, %s5497_s30   ;;  %s3634_s29 = sphi %s3707_s29, %s5508_s29   ;;  %s3630_s28 = sphi %s3705_s28, %s5495_s28   ;;  %s3626_s27 = sphi %s3703_s27, %s5507_s27   ;;  %s3622_s26 = sphi %s3701_s26, %s5506_s26   ;;  %s3618_s25 = sphi %s3699_s25, %s5505_s25   ;;  %s3614_s24 = sphi %s3697_s24, %s5504_s24   ;;  %s3610_s23 = sphi %s3695_s23, %s5503_s23   ;;  %s3606_s22 = sphi %s3693_s22, %s5502_s22   ;;  %s3602_s21 = sphi %s3691_s21, %s5501_s21   ;;  %s3598_s20 = sphi %s3689_s20, %s5500_s20   ;;  %s3594_s19 = sphi %s3687_s19, %s5499_s19   ;;  %s3590_s18 = sphi %s3685_s18, %s5492_s18  }
  0x13   : > { %5377 = sst [smem:[#allocation18_spill]] %s3594_s19  ;;  %s2522_s8 = sadd.s32 4294967294, %s3642_s6  }
  0x14   : > { %5378 = sst [smem:[#allocation19_spill]] %s3606_s22  ;;  %p52_p0 = scmp.eq.s32.totalorder %s3642_s6, 0 }
  0x15   : > { %5379 = sst [smem:[#allocation20_spill]] %s3626_s27  ;;  %p57_p1 = scmp.ne.s32.totalorder %s3618_s25, %s3614_s24 }
  0x16   : > { %5380 = sst [smem:[#allocation21_spill]] %s3630_s28  ;;  %p5337_p2 = scmp.eq.s32.totalorder %s3752_s7, 0 }
  0x17   : > { %5381 = sst [smem:[#allocation22_spill]] %s3638_s30  ;;  %p119_p3 = scmp.ne.s32.totalorder %s3610_s23, %s3606_s22 }
  0x18   : > { %5382 = sst [smem:[#allocation23_spill]] %s3642_s6  ;;  %p125_p4 = scmp.ne.s32.totalorder %s3606_s22, %s3602_s21 }
  0x19   : > { %p3764_p5 = por %p5337_p2, %p57_p1  ;;  %p3771_p6 = por %p119_p3, %p52_p0 }
  0x1a   : > { %p3777_p7 = por %p125_p4, %p5337_p2  ;;  %p176_p8 = scmp.ne.s32.totalorder %s3598_s20, %s3594_s19 }
  0x1b   : > { %p177_p9 = scmp.eq.s32.totalorder %s3752_s7, 5  ;;  %p182_p10 = scmp.ne.s32.totalorder %s3594_s19, %s3590_s18 }
  0x1c   : > { %s5385_s13 = scalar_select %p3777_p7, 1, 0 }
  0x1d   : > { %p183_p11 = scmp.eq.s32.totalorder %s2522_s8, 5  ;;  %p3786_p12 = por %p177_p9, %p176_p8 }
  0x1e   : > { %5386 = sst [smem:[#allocation24_spill]] %s5385_s13  ;;  %p2523_p13 = scmp.ge.s32.totalorder %s3642_s6, 1 }
  0x1f   : > { %s5387_s14 = scalar_select %p3786_p12, 1, 0 }
  0x20   : > { %p3791_p1 = por %p183_p11, %p182_p10  ;;  %p190_p3 = scmp.lt.s32.totalorder %s3642_s6, 7 }
  0x21   : > { %5388 = sst [smem:[#allocation25_spill]] %s5387_s14  ;;  %s3644_s8 = smov [#allocation6]  }
  0x22   : > { %s5389_s15 = scalar_select %p3791_p1, 1, 0 }
  0x23   : > { %s5391_s1 = sld [smem:[#allocation54_spill]]  ;;  %p3799_p4 = pnand %p2523_p13, %p190_p3 }
  0x24   : > { %5390 = sst [smem:[#allocation26_spill]] %s5389_s15  ;;  %s204_s11 = sshll.u32 %s3644_s8, 4  ;;  %s205_s11 = int_to_ptr.vmem [resolvable:$true] %s204_s11 }
  0x25   : > { %p3150_p8 = pneg %p3799_p4  ;;  %p3173_p9 = scmp.lt.s32.totalorder %s3642_s6, 6 }
  0x26   : > { %s34_s9 = sadd.s32 1, %s3634_s29  ;;  %s5335_s15 = sand.u32 1, %s3610_s23  }
  0x27   : > { %p3808_p10 = pnand %p3150_p8, %p5337_p2  ;;  %p3816_p11 = pnand %p3173_p9, %p3771_p6 }
  0x28   : > { %p3823_p13 = scmp.ge.s32.totalorder %s34_s9, 3  ;;  %s3129_s12 = smul.u32 768, %s5335_s15 }
  0x29   : > { %s202_s21 = sshll.u32 %s5391_s1, 4  ;;  %s250_s1 = sand.u32 1, %s3642_s6   ;;  %s203_s21 = int_to_ptr.hbm [resolvable:$true] %s202_s21 }
  0x2a   : > { %3153 = dma.hbm_to_vmem [thread:$0]  (!%p3808_p10), %s203_s21, 48, %s205_s11, [#allocation7]  }
  0x2b   : > { %s5510_s9 = smov (%p3823_p13, %s34_s9), 0  ;;  %s3009_s14 = sshll.u32 %s3634_s29, 4 }
  0x2c   : > { %5396 = sst [smem:[#allocation27_spill]] %s5510_s9  ;;  %s3837_s18 = ssub.s32 %s3634_s29, %s5510_s9 }
  0x2d   : > { %p110_p6 = scmp.eq.s32.totalorder %s3837_s18, 0  ;;  %s5397_s3 = sld [smem:[#allocation56_spill]] }
  0x2e   : > { %s254_s28 = scalar_lea.vmem [#allocation9], %s3129_s12  ;;  %s5398_s19 = sadd.s32 1, %s3610_s23 }
  0x2f   : > { %s262_s27 = sshll.u32 %s254_s28, 4  ;;  %s3849_s15 = scalar_lea.sflag [#allocation10], %s250_s1  ;;  %s263_s27 = int_to_ptr.vmem [resolvable:$true] %s262_s27 }
  0x30   : > { %s3847_s13 = scalar_select %p110_p6, %s3610_s23, %s5398_s19  }
  0x31   : > { %s3646_s12 = smov 256   ;;  %s3647_s28 = smov 16  }
  0x32   : > { %5399 = sst [smem:[#allocation28_spill]] %s3847_s13  ;;  %s3648_s21 = smov [#allocation8]  }
  0x33   : > { %s259_s5 = scalar_lea.hbm %s5397_s3, %s3009_s14  ;;  %s3645_s14 = smov 768  }
  0x34   : > { %s260_s22 = sshll.u32 %s259_s5, 4  ;;  %s5400_s2 = sld [smem:[#allocation55_spill]]  ;;  %s261_s22 = int_to_ptr.hbm [resolvable:$true] %s260_s22 }
  0x35   : > { %3163 = dma.hbm_to_vmem [thread:$0]  (!%p3816_p11), %s261_s22, 12288, %s263_s27, %s3849_s15, %s3645_s14, %s3646_s12, %s3647_s28  }
  0x36   : > { %s216_s3 = sshll.u32 %s3648_s21, 4  ;;  %s44_s1 = sadd.s32 1, %s3622_s26  ;;  %s217_s3 = int_to_ptr.vmem [resolvable:$true] %s216_s3 }
  0x37   : > { %s37_s9 = sadd.s32 1, %s3638_s30  ;;  %p51_p3 = scmp.ne.s32.totalorder %s3622_s26, %s3618_s25 }
  0x38   : > { %s5512_s9 = smov (!%p3823_p13, %s37_s9), %s3638_s30  ;;  %s227_s22 = sand.u32 1, %s3622_s26  }
  0x39   : > { %p53_p8 = por %p52_p0, %p51_p3  ;;  %p39_p6 = scmp.ge.s32.totalorder %s5512_s9, 2 }
  0x3a   : > { %s214_s5 = sshll.u32 %s5400_s2, 4  ;;  %s3127_s27 = smul.u32 336, %s227_s22  ;;  %s215_s5 = int_to_ptr.hbm [resolvable:$true] %s214_s5 }
  0x3b   : > { %3156 = dma.hbm_to_vmem [thread:$0]  (!%p3808_p10), %s215_s5, 48, %s217_s3, [#allocation7]  }
  0x3c   : > { %p3871_p2 = pnand %p3173_p9, %p53_p8  ;;  %s5514_s9 = smov (%p39_p6, %s5512_s9), 0 }
  0x3d   : > { %5402 = sst [smem:[#allocation29_spill]] %s5514_s9  ;;  %s41_s3 = ssub.s32 %s3638_s30, %s5514_s9 }
  0x3e   : > { %s3174_s16 = smul.u32 336, %s3638_s30  ;;  %p42_p10 = scmp.eq.s32.totalorder %s41_s3, 0 }
  0x3f   : > { %s163_s8 = sor.u32 %s3837_s18, %s41_s3  ;;  %s5403_s5 = sadd.s32 1, %s3598_s20 }
  0x40   : > { %p164_p13 = scmp.eq.s32.totalorder %s163_s8, 0  ;;  %s237_s19 = scalar_lea.hbm %s5319_s0, %s3174_s16 }
  0x41   : > { %s3885_s11 = scalar_select %p42_p10, %s3622_s26, %s44_s1  }
  0x42   : > { %s3890_s21 = scalar_select %p164_p13, %s3598_s20, %s5403_s5  }
  0x43   : > { %s238_s2 = sshll.u32 %s237_s19, 4  ;;  %s231_s13 = scalar_lea.vmem [#allocation3], %s3127_s27  ;;  %s239_s2 = int_to_ptr.hbm [resolvable:$true] %s238_s2 }
  0x44   : > { %s240_s9 = sshll.u32 %s231_s13, 4  ;;  %s5404_s30 = sand.u32 1, %s3610_s23   ;;  %s241_s9 = int_to_ptr.vmem [resolvable:$true] %s240_s9 }
  0x45   : > { %s2530_s6 = sshll.u32 %s5404_s30, 2  ;;  %s228_s18 = scalar_lea.sflag [#allocation4], %s227_s22 }
  0x46   : > { %s3649_s3 = smov 384   ;;  %s3650_s8 = smov 24  }
  0x47   : > { %3160 = dma.hbm_to_vmem [thread:$0]  (!%p3871_p2), %s239_s2, 5376, %s241_s9, %s228_s18, %s3649_s3, %s3649_s3, %s3650_s8  }
  0x48   : > { %s2531_s16 = sshll.u32 %s3634_s29, 2  ;;  %s276_s5 = scalar_lea.vmem [#allocation11], %s2530_s6 }
  0x49   : > { %s280_s28 = scalar_lea.hbm %s5323_s4, %s2531_s16  ;;  %s284_s19 = sshll.u32 %s276_s5, 4  ;;  %s285_s19 = int_to_ptr.vmem [resolvable:$true] %s284_s19 }
  0x4a   : > { %s282_s27 = sshll.u32 %s280_s28, 4  ;;  %293 = sbr.rel (%p3799_p4) target bundleno = 884 (0x374), region = 40  ;;  %s283_s27 = int_to_ptr.hbm [resolvable:$true] %s282_s27 }
  0x4b   : > { %3166 = dma.hbm_to_vmem [thread:$0]  (!%p3816_p11), %s283_s27, 64, %s285_s19, %s3849_s15  }
  0x4c   : > { %s295_s30 = sand.u32 (!%p3799_p4), 1, %s3618_s25  }
  0x4d   : > { %s3130_s13 = smul.u32 (!%p3799_p4), 336, %s295_s30  ;;  %s296_s2 = scalar_lea.sflag (!%p3799_p4), [#allocation4], %s295_s30 }
  0x4f   : > { %s3906_s9 = scalar_lea.vmem [#allocation3], %s3130_s13 }
  0x50   : > { %3573 = dma.done.wait (%p3764_p5), %s296_s2, 5376  }
  0x51   : > { %3575 = vsyncadd (%p3764_p5), %s296_s2, 4294961920  ;;  %p5405_p0 = scmp.eq.s32.totalorder %s3752_s7, 0 }
  0x53   : > { %3577 = dma.done.wait (%p5405_p0), [#allocation7], 96   ;;  %p5406_p2 = pmov %p5405_p0 }
  0x54   : > { %s5407_s6 = sld [smem:[#allocation19_spill]]  ;;  %s315_s24 = sand.u32 1, %s3752_s7  }
  0x55   : > { %3579 = vsyncadd (%p5406_p2), [#allocation7], 4294967200  ;;  %s316_s14 = scalar_lea.sflag [#allocation10], %s315_s24 }
  0x5a   : > { %s317_s17 = sand.u32 1, %s5407_s6  }
  0x5b   : > { %s3131_s22 = smul.u32 768, %s317_s17 }
  0x5d   : > { %s3918_s18 = scalar_lea.vmem [#allocation9], %s3131_s22 }
  0x5e   : > { %3581 = dma.done.wait (%p3777_p7), %s316_s14, 12352  }
  0x5f   : > { %3583 = vsyncadd (%p3777_p7), %s316_s14, 4294954944  ;;  %s5409_s10 = sld [smem:[#allocation18_spill]]  ;;  %s3924_s3 = sshll.u32 %s317_s17, 2 }
  0x60   : > { %s329_s1 = scalar_lea.vmem [#allocation11], %s3924_s3  ;;  %s5410_s12 = sld [smem:[#allocation20_spill]] }
  0x65   : > { %s364_s8 = sand.u32 1, %s5409_s10  }
  0x66   : > { %s3132_s16 = smul.u32 448, %s364_s8  ;;  %p2536_p5 = scmp.ne.s32.totalorder %s5410_s12, 0 }
  0x68   : > { %s3930_s7 = scalar_lea.vmem [#allocation12], %s3132_s16  ;;  %375 = sbr.rel (%p2536_p5) target bundleno = 379 (0x17b), region = 64 }
  0x6d   : > { %v3934_v0 = vld [vmem:[%s3906_s9 + $0x60] sm:$0xff]  ;;  %v3937_v1 = vld [vmem:[%s3906_s9 + $0x68] sm:$0xff]  ;;  %v3940_v2 = vld [vmem:[%s3906_s9 + $0x70] sm:$0xff] }
  0x6e   : > { %5411 = vst [vmem:[#allocation30_spill] sm:$0xff] %v3940_v2  ;;  %v434_v3 = vadd.f32 %v3937_v1, %v3934_v0  ;;  %v3945_v4 = vld [vmem:[%s3906_s9 + $0x30] sm:$0xff]  ;;  %v3948_v5 = vld [vmem:[%s3906_s9 + $0x38] sm:$0xff]  ;;  %v3951_v6 = vld [vmem:[%s3906_s9 + $0x40] sm:$0xff] }
  0x6f   : > { %v426_v7 = vadd.f32 %v3948_v5, %v3945_v4  ;;  %v3956_v8 = vld [vmem:[%s3906_s9] sm:$0xff]  ;;  %v3959_v9 = vld [vmem:[%s3906_s9 + $0x8] sm:$0xff]  ;;  %v3962_v10 = vld [vmem:[%s3906_s9 + $0x10] sm:$0xff] }
  0x70   : > { %v435_v11 = vadd.f32 %v434_v3, %v3940_v2  ;;  %v418_v12 = vadd.f32 %v3959_v9, %v3956_v8  ;;  %v3968_v13 = vld [vmem:[%s3906_s9 + $0x78] sm:$0xff]  ;;  %v3971_v14 = vld [vmem:[%s3906_s9 + $0x80] sm:$0xff]  ;;  %v3975_v16 = vld [vmem:[%s3906_s9 + $0x48] sm:$0xff]  ;;  %v495_v58 = vmul.f32 %v3956_v8, %v3956_v8  ;;  %v496_v59 = vmul.f32 %v3959_v9, %v3959_v9 }
  0x71   : > { %v427_v15 = vadd.f32 %v426_v7, %v3951_v6  ;;  %v3978_v17 = vld [vmem:[%s3906_s9 + $0x50] sm:$0xff]  ;;  %v438_v19 = vadd.f32 %v3971_v14, %v3968_v13  ;;  %v3984_v20 = vld [vmem:[%s3906_s9 + $0x18] sm:$0xff]  ;;  %v3987_v21 = vld [vmem:[%s3906_s9 + $0x20] sm:$0xff] }
  0x72   : > { %436 = vadd.xlane.f32.xlu2 %v435_v11  ;;  %v419_v18 = vadd.f32 %v418_v12, %v3962_v10  ;;  %v3990_v22 = vld [vmem:[%s3906_s9 + $0x88] sm:$0xff]  ;;  %v430_v23 = vadd.f32 %v3978_v17, %v3975_v16  ;;  %v3995_v24 = vld [vmem:[%s3906_s9 + $0x58] sm:$0xff]  ;;  %v422_v25 = vadd.f32 %v3987_v21, %v3984_v20  ;;  %v4005_v29 = vld [vmem:[%s3906_s9 + $0xc0] sm:$0xff]  ;;  %v497_v11 = vmul.f32 %v3962_v10, %v3962_v10 }
  0x73   : > { %428 = vadd.xlane.f32.xlu1 %v427_v15  ;;  %v4000_v26 = vld [vmem:[%s3906_s9 + $0x28] sm:$0xff]  ;;  %v439_v27 = vadd.f32 %v438_v19, %v3990_v22  ;;  %5412 = vst [vmem:[#allocation31_spill] sm:$0xff] %v4005_v29  ;;  %v4015_v33 = vld [vmem:[%s3906_s9 + $0xb0] sm:$0xff]  ;;  %v4021_v35 = vld [vmem:[%s3906_s9 + $0x98] sm:$0xff]  ;;  %v537_v12 = vadd.f32 %v496_v59, %v495_v58 }
  0x74   : > { %420 = vadd.xlane.f32.xlu0 %v419_v18  ;;  %v431_v28 = vadd.f32 %v430_v23, %v3995_v24  ;;  %v4008_v30 = vld [vmem:[%s3906_s9 + $0xc8] sm:$0xff]  ;;  %v423_v31 = vadd.f32 %v422_v25, %v4000_v26  ;;  %5415 = vst [vmem:[#allocation34_spill] sm:$0xff] %v4015_v33  ;;  %v4018_v34 = vld [vmem:[%s3906_s9 + $0x90] sm:$0xff]  ;;  %v4031_v39 = vld [vmem:[%s3906_s9 + $0xb8] sm:$0xff] }
  0x75   : > { %5413 = vst [vmem:[#allocation32_spill] sm:$0xff] %v4008_v30  ;;  %v4012_v32 = vld [vmem:[%s3906_s9 + $0xa8] sm:$0xff]  ;;  %v450_v36 = vadd.f32 %v4008_v30, %v4005_v29  ;;  %v4026_v37 = vld [vmem:[%s3906_s9 + $0xd0] sm:$0xff]  ;;  %v442_v40 = vadd.f32 %v4021_v35, %v4018_v34  ;;  %v4036_v41 = vld [vmem:[%s3906_s9 + $0xa0] sm:$0xff]  ;;  %v538_v25 = vadd.f32 %v537_v12, %v497_v11  ;;  %v510_v12 = vmul.f32 %v3968_v13, %v3968_v13 }
  0x76   : > { %5414 = vst [vmem:[#allocation33_spill] sm:$0xff] %v4012_v32  ;;  %v446_v38 = vadd.f32 %v4015_v33, %v4012_v32  ;;  %v4041_v44 = vld [vmem:[%s3906_s9 + $0x108] sm:$0xff]  ;;  %v4044_v45 = vld [vmem:[%s3906_s9 + $0x110] sm:$0xff]  ;;  %v4051_v48 = vld [vmem:[%s3906_s9 + $0xf8] sm:$0xff] }
  0x77   : > { %5416 = vst [vmem:[#allocation35_spill] sm:$0xff] %v4026_v37  ;;  %v451_v42 = vadd.f32 %v450_v36, %v4026_v37  ;;  %v443_v46 = vadd.f32 %v442_v40, %v4036_v41  ;;  %v4048_v47 = vld [vmem:[%s3906_s9 + $0xf0] sm:$0xff]  ;;  %v4054_v49 = vld [vmem:[%s3906_s9 + $0xd8] sm:$0xff]  ;;  %v4057_v50 = vld [vmem:[%s3906_s9 + $0xe0] sm:$0xff]  ;;  %v462_v51 = vadd.f32 %v4044_v45, %v4041_v44  ;;  %v501_v36 = vmul.f32 %v3945_v4, %v3945_v4 }
  0x78   : > { %5417 = vst [vmem:[#allocation36_spill] sm:$0xff] %v4031_v39  ;;  %v447_v43 = vadd.f32 %v446_v38, %v4031_v39  ;;  %v4062_v52 = vld [vmem:[%s3906_s9 + $0x118] sm:$0xff]  ;;  %v458_v53 = vadd.f32 %v4051_v48, %v4048_v47  ;;  %v4067_v54 = vld [vmem:[%s3906_s9 + $0x100] sm:$0xff]  ;;  %v454_v55 = vadd.f32 %v4057_v50, %v4054_v49  ;;  %v4072_v56 = vld [vmem:[%s3906_s9 + $0xe8] sm:$0xff]  ;;  %v502_v38 = vmul.f32 %v3948_v5, %v3948_v5 }
  0x79   : > { %5418 = vst [vmem:[#allocation37_spill] sm:$0xff] %v4041_v44  ;;  %v463_v57 = vadd.f32 %v462_v51, %v4062_v52  ;;  %v4082_v62 = vld [vmem:[%s3906_s9 + $0x138] sm:$0xff]  ;;  %v4085_v63 = vld [vmem:[%s3906_s9 + $0x140] sm:$0xff]  ;;  %v4091_v7 = vld [vmem:[%s3906_s9 + $0x128] sm:$0xff] }
  0x7a   : > { %440 = vadd.xlane.f32.xlu2 %v439_v27  ;;  %5419 = vst [vmem:[#allocation38_spill] sm:$0xff] %v4044_v45  ;;  %v459_v60 = vadd.f32 %v458_v53, %v4067_v54  ;;  %v455_v61 = vadd.f32 %v454_v55, %v4072_v56  ;;  %v4088_v3 = vld [vmem:[%s3906_s9 + $0x120] sm:$0xff]  ;;  %v470_v15 = vadd.f32 %v4085_v63, %v4082_v62  ;;  %v4098_v18 = vld [vmem:[%s3906_s9 + $0x148] sm:$0xff]  ;;  %v4103_v23 = vld [vmem:[%s3906_s9 + $0x130] sm:$0xff] }
  0x7b   : > { %432 = vadd.xlane.f32.xlu1 %v431_v28  ;;  %5420 = vst [vmem:[#allocation39_spill] sm:$0xff] %v4054_v49  ;;  %v466_v19 = vadd.f32 %v4091_v7, %v4088_v3  ;;  %v504_v27 = vmul.f32 %v3975_v16, %v3975_v16  ;;  %v505_v28 = vmul.f32 %v3978_v17, %v3978_v17 }
  0x7c   : > { %424 = vadd.xlane.f32.xlu0 %v423_v31  ;;  %5421 = vst [vmem:[#allocation40_spill] sm:$0xff] %v4057_v50  ;;  %v471_v31 = vadd.f32 %v470_v15, %v4098_v18  ;;  %v503_v53 = vmul.f32 %v3951_v6, %v3951_v6  ;;  %v545_v55 = vadd.f32 %v502_v38, %v501_v36 }
  0x7d   : > { %5422 = vst [vmem:[#allocation41_spill] sm:$0xff] %v4062_v52  ;;  %v467_v40 = vadd.f32 %v466_v19, %v4103_v23  ;;  %v549_v51 = vadd.f32 %v505_v28, %v504_v27  ;;  %v511_v15 = vmul.f32 %v3971_v14, %v3971_v14  ;;  %v508_v27 = vmul.f32 %v3937_v1, %v3937_v1 }
  0x7e   : > { %5423 = vst [vmem:[#allocation42_spill] sm:$0xff] %v4072_v56  ;;  %v546_v11 = vadd.f32 %v545_v55, %v503_v53  ;;  %v515_v28 = vmul.f32 %v4036_v41, %v4036_v41  ;;  %v512_v36 = vmul.f32 %v3990_v22, %v3990_v22  ;;  %v519_v55 = vmul.f32 %v4005_v29, %v4005_v29 }
  0x7f   : > { %5424 = vst [vmem:[#allocation43_spill] sm:$0xff] %v4088_v3  ;;  %v557_v38 = vadd.f32 %v511_v15, %v510_v12  ;;  %v521_v12 = vmul.f32 %v4026_v37, %v4026_v37 }
  0x80   : > { %5425 = vst [vmem:[#allocation44_spill] sm:$0xff] %v4091_v7 }
  0x81   : > { %5426 = vst [vmem:[#allocation45_spill] sm:$0xff] %v4103_v23  ;;  %v558_v53 = vadd.f32 %v557_v38, %v512_v36  ;;  %v528_v38 = vmul.f32 %v4041_v44, %v4041_v44 }
  0x82   : > { %452 = vadd.xlane.f32.xlu2 %v451_v42  ;;  %v498_v42 = vmul.f32 %v3984_v20, %v3984_v20 }
  0x83   : > { %448 = vadd.xlane.f32.xlu1 %v447_v43  ;;  %v499_v43 = vmul.f32 %v3987_v21, %v3987_v21 }
  0x84   : > { %444 = vadd.xlane.f32.xlu0 %v443_v46  ;;  %v506_v46 = vmul.f32 %v3995_v24, %v3995_v24 }
  0x85   : > { %v541_v58 = vadd.f32 %v499_v43, %v498_v42 }
  0x86   : > { %v550_v59 = vadd.f32 %v549_v51, %v506_v46  ;;  %v522_v46 = vmul.f32 %v4054_v49, %v4054_v49  ;;  %v523_v51 = vmul.f32 %v4057_v50, %v4057_v50 }
  0x8a   : > { %464 = vadd.xlane.f32.xlu2 %v463_v57  ;;  %v500_v57 = vmul.f32 %v4000_v26, %v4000_v26 }
  0x8b   : > { %460 = vadd.xlane.f32.xlu1 %v459_v60  ;;  %v513_v60 = vmul.f32 %v4018_v34, %v4018_v34 }
  0x8c   : > { %456 = vadd.xlane.f32.xlu0 %v455_v61  ;;  %v514_v61 = vmul.f32 %v4021_v35, %v4021_v35  ;;  %v542_v19 = vadd.f32 %v541_v58, %v500_v57  ;;  %v520_v57 = vmul.f32 %v4008_v30, %v4008_v30 }
  0x8e   : > { %v569_v15 = vadd.f32 %v520_v57, %v519_v55  ;;  %v530_v55 = vmul.f32 %v4062_v52, %v4062_v52 }
  0x90   : > { %v570_v36 = vadd.f32 %v569_v15, %v521_v12  ;;  %v536_v12 = vmul.f32 %v4098_v18, %v4098_v18 }
  0x92   : > { %539 = vadd.xlane.f32.xlu2 %v538_v25  ;;  %v507_v25 = vmul.f32 %v3934_v0, %v3934_v0 }
  0x93   : > { %472 = vadd.xlane.f32.xlu1 %v471_v31  ;;  %v561_v31 = vadd.f32 %v514_v61, %v513_v60  ;;  %v517_v60 = vmul.f32 %v4015_v33, %v4015_v33  ;;  %v524_v61 = vmul.f32 %v4072_v56, %v4072_v56 }
  0x94   : > { %468 = vadd.xlane.f32.xlu0 %v467_v40  ;;  %v509_v40 = vmul.f32 %v3940_v2, %v3940_v2  ;;  %v553_v42 = vadd.f32 %v508_v27, %v507_v25 }
  0x95   : > { %v562_v43 = vadd.f32 %v561_v31, %v515_v28  ;;  %v531_v28 = vmul.f32 %v4088_v3, %v4088_v3  ;;  %v532_v31 = vmul.f32 %v4091_v7, %v4091_v7 }
  0x96   : > { %v554_v58 = vadd.f32 %v553_v42, %v509_v40  ;;  %v529_v40 = vmul.f32 %v4044_v45, %v4044_v45 }
  0x98   : > { %v581_v57 = vadd.f32 %v529_v40, %v528_v38 }
  0x9a   : > { %551 = vadd.xlane.f32.xlu2 %v550_v59  ;;  %v516_v59 = vmul.f32 %v4012_v32, %v4012_v32 }
  0x9b   : > { %547 = vadd.xlane.f32.xlu1 %v546_v11  ;;  %v573_v11 = vadd.f32 %v523_v51, %v522_v46  ;;  %v526_v46 = vmul.f32 %v4051_v48, %v4051_v48  ;;  %v533_v51 = vmul.f32 %v4103_v23, %v4103_v23  ;;  %v534_v48 = vmul.f32 %v4082_v62, %v4082_v62 }
  0x9c   : > { %543 = vadd.xlane.f32.xlu0 %v542_v19  ;;  %v518_v19 = vmul.f32 %v4031_v39, %v4031_v39  ;;  %v565_v25 = vadd.f32 %v517_v60, %v516_v59 }
  0x9d   : > { %v574_v27 = vadd.f32 %v573_v11, %v524_v61  ;;  %v535_v11 = vmul.f32 %v4085_v63, %v4085_v63 }
  0x9e   : > { %v566_v42 = vadd.f32 %v565_v25, %v518_v19  ;;  %v3651_v25 = vmov 384.0  }
  0x9f   : > { %v589_v15 = vadd.f32 %v535_v11, %v534_v48  ;;  %3302 = vrcp.f32 %v3651_v25 }
  0xa1   : > { %v590_v19 = vadd.f32 %v589_v15, %v536_v12 }
  0xa2   : > { %563 = vadd.xlane.f32.xlu2 %v562_v43  ;;  %v525_v43 = vmul.f32 %v4048_v47, %v4048_v47  ;;  %v582_v47 = vadd.f32 %v581_v57, %v530_v55 }
  0xa3   : > { %559 = vadd.xlane.f32.xlu1 %v558_v53  ;;  %v585_v53 = vadd.f32 %v532_v31, %v531_v28 }
  0xa4   : > { %555 = vadd.xlane.f32.xlu0 %v554_v58  ;;  %v527_v58 = vmul.f32 %v4067_v54, %v4067_v54  ;;  %v577_v59 = vadd.f32 %v526_v46, %v525_v43 }
  0xa5   : > { %v586_v60 = vadd.f32 %v585_v53, %v533_v51  ;;  %v3303_v31 = vpop.eup %3302 }
  0xa6   : > { %v578_v61 = vadd.f32 %v577_v59, %v527_v58  ;;  %v475_v38 = vmul.f32 384.0, %v3303_v31  ;;  %vm479_vm0 = vweird.f32 %v3303_v31 }
  0xa8   : > { %v476_v63 = vsub.f32 1.0, %v475_v38 }
  0xaa   : > { %575 = vadd.xlane.f32.xlu2 %v574_v27  ;;  %v477_v46 = vmul.f32 %v3303_v31, %v476_v63 }
  0xab   : > { %571 = vadd.xlane.f32.xlu1 %v570_v36 }
  0xac   : > { %567 = vadd.xlane.f32.xlu0 %v566_v42  ;;  %v478_v18 = vadd.f32 %v3303_v31, %v477_v46 }
  0xae   : > { %v4191_v57 = vsel %vm479_vm0, %v3303_v31, %v478_v18  ;;  %v937_v18 = vld [vmem:[#allocation8] sm:$0x7] }
  0xaf   : > { %v4254_v23 = vperm.slane %v937_v18, 2 }
  0xb2   : > { %587 = vadd.xlane.f32.xlu2 %v586_v60 }
  0xb3   : > { %583 = vadd.xlane.f32.xlu1 %v582_v47 }
  0xb4   : > { %579 = vadd.xlane.f32.xlu0 %v578_v61 }
  0xbc   : > { %591 = vadd.xlane.f32.xlu0 %v590_v19 }
  0xe5   : > { %v437_v54 = vpop.xlane.xlu2 %436 }
  0xe6   : > { %v429_v27 = vpop.xlane.xlu1 %428  ;;  %v4199_v60 = vmul.f32 %v4191_v57, %v437_v54  ;;  %v4252_v54 = vperm.slane %v937_v18, 1 }
  0xe7   : > { %v421_v28 = vpop.xlane.xlu0 %420  ;;  %v4202_v47 = vmul.f32 %v4191_v57, %v429_v27  ;;  %v887_v27 = vld [vmem:[#allocation6] sm:$0x7] }
  0xe8   : > { %v4196_v59 = vmul.f32 %v4191_v57, %v421_v28  ;;  %v4237_v63 = vperm.slane %v887_v27, 0  ;;  %v4244_v31 = vperm.slane %v887_v27, 2  ;;  %v4258_v7 = vmul.f32 %v4199_v60, %v4199_v60 }
  0xea   : > { %v607_v12 = vmul.f32 %v4196_v59, %v4196_v59 }
  0xed   : > { %v441_v36 = vpop.xlane.xlu2 %440 }
  0xee   : > { %v433_v62 = vpop.xlane.xlu1 %432  ;;  %v4224_v46 = vmul.f32 %v4191_v57, %v441_v36  ;;  %v4239_v36 = vperm.slane %v887_v27, 1 }
  0xef   : > { %v425_v40 = vpop.xlane.xlu0 %424  ;;  %v4229_v25 = vmul.f32 %v4191_v57, %v433_v62  ;;  %v4246_v62 = vperm.slane %v937_v18, 0 }
  0xf0   : > { %v4242_v38 = vmul.f32 %v4191_v57, %v425_v40 }
  0xf2   : > { %v608_v50 = vmul.f32 %v4242_v38, %v4242_v38 }
  0xf5   : > { %v453_v42 = vpop.xlane.xlu2 %452 }
  0xf6   : > { %v4185_v43 = vpop.xlane.xlu1 %448  ;;  %v4271_v52 = vmul.f32 %v4191_v57, %v453_v42 }
  0xf7   : > { %v445_v51 = vpop.xlane.xlu0 %444  ;;  %v4294_v18 = vmul.f32 %v4191_v57, %v4185_v43 }
  0xf8   : > { %5428 = vst [vmem:[#allocation47_spill] sm:$0xff] %v4271_v52  ;;  %v4284_v42 = vmul.f32 %v4191_v57, %v445_v51  ;;  %v612_v51 = vmul.f32 %v4224_v46, %v4224_v46  ;;  %v4311_v49 = vmul.f32 %v4271_v52, %v4271_v52 }
  0xf9   : > { %5429 = vst [vmem:[#allocation48_spill] sm:$0xff] %v4294_v18  ;;  %v4342_v32 = vmul.f32 %v4294_v18, %v4294_v18  ;;  %v5437_v18 = vsub.f32 %v3962_v10, %v4196_v59 }
  0xfd   : > { %v4187_v53 = vpop.xlane.xlu2 %464 }
  0xfe   : > { %v4189_v55 = vpop.xlane.xlu1 %460 }
  0xff   : > { %v4193_v58 = vpop.xlane.xlu0 %456 }
 0x105   : > { %v540_v61 = vpop.xlane.xlu2 %539 }
 0x106   : > { %v4204_v48 = vpop.xlane.xlu1 %472  ;;  %v593_v11 = vmul.f32 %v540_v61, %v4191_v57 }
 0x107   : > { %5427 = vst [vmem:[#allocation46_spill] sm:$0xff] %v4204_v48  ;;  %v4209_v15 = vpop.xlane.xlu0 %468 }
 0x108   : > { %v621_v28 = vsub.f32 %v593_v11, %v607_v12  ;;  %v609_v12 = vmul.f32 %v4202_v47, %v4202_v47 }
 0x10a   : > { %v635_v11 = vmax.f32 %v621_v28, 0.0 }
 0x10c   : > { %v4248_v28 = vadd.f32 1e-05, %v635_v11  ;;  %v610_v11 = vmul.f32 %v4229_v25, %v4229_v25 }
 0x10d   : > { %v552_v19 = vpop.xlane.xlu2 %551 }
 0x10e   : > { %3304 = vrsqrt.f32 %v4248_v28  ;;  %v548_v27 = vpop.xlane.xlu1 %547  ;;  %v596_v61 = vmul.f32 %v552_v19, %v4191_v57  ;;  %vm711_vm2 = vweird.f32 %v4248_v28 }
 0x10f   : > { %v595_v45 = vmul.f32 %v548_v27, %v4191_v57  ;;  %v544_v40 = vpop.xlane.xlu0 %543 }
 0x110   : > { %v624_v56 = vsub.f32 %v596_v61, %v610_v11  ;;  %v594_v19 = vmul.f32 %v544_v40, %v4191_v57  ;;  %v4323_v61 = vmul.f32 %v4191_v57, %v4193_v58 }
 0x111   : > { %v623_v27 = vsub.f32 %v595_v45, %v609_v12  ;;  %v4315_v12 = vmul.f32 %v4191_v57, %v4187_v53  ;;  %v4329_v53 = vmul.f32 %v4191_v57, %v4209_v15 }
 0x112   : > { %v638_v11 = vmax.f32 %v624_v56, 0.0  ;;  %v622_v44 = vsub.f32 %v594_v19, %v608_v50  ;;  %5431 = vst [vmem:[#allocation50_spill] sm:$0xff] %v4323_v61 }
 0x113   : > { %v637_v3 = vmax.f32 %v623_v27, 0.0  ;;  %v613_v27 = vmul.f32 %v4284_v42, %v4284_v42  ;;  %5430 = vst [vmem:[#allocation49_spill] sm:$0xff] %v4315_v12 }
 0x114   : > { %v3305_v45 = vpop.eup %3304  ;;  %v4302_v56 = vadd.f32 1e-05, %v638_v11  ;;  %v636_v50 = vmax.f32 %v622_v44, 0.0  ;;  %5432 = vst [vmem:[#allocation51_spill] sm:$0xff] %v4329_v53 }
 0x115   : > { %v706_v19 = vmul.f32 %v3305_v45, %v4248_v28  ;;  %v4305_v40 = vadd.f32 1e-05, %v637_v3  ;;  %v564_v43 = vpop.xlane.xlu2 %563  ;;  %vm712_vm1 = vweird.f32 %v3305_v45 }
 0x116   : > { %3306 = vrsqrt.f32 %v4302_v56  ;;  %v4318_v11 = vadd.f32 1e-05, %v636_v50  ;;  %v560_v44 = vpop.xlane.xlu1 %559  ;;  %v599_v3 = vmul.f32 %v564_v43, %v4191_v57  ;;  %vm741_vm3 = vweird.f32 %v4302_v56  ;;  %vm713_vm4 = vmor %vm711_vm2, %vm712_vm1 }
 0x117   : > { %v707_v37 = vmul.f32 %v3305_v45, %v706_v19  ;;  %3308 = vrsqrt.f32 %v4305_v40  ;;  %v598_v30 = vmul.f32 %v560_v44, %v4191_v57  ;;  %v556_v52 = vpop.xlane.xlu0 %555  ;;  %vm731_vm5 = vweird.f32 %v4305_v40 }
 0x118   : > { %3310 = vrsqrt.f32 %v4318_v11  ;;  %v627_v50 = vsub.f32 %v599_v3, %v613_v27  ;;  %v597_v29 = vmul.f32 %v556_v52, %v4191_v57  ;;  %v4346_v52 = vmul.f32 %v4191_v57, %v4189_v55 }
 0x119   : > { %v708_v19 = vmul.f32 0.5, %v707_v37  ;;  %v626_v39 = vsub.f32 %v598_v30, %v612_v51  ;;  %v4350_v37 = vmul.f32 %v4323_v61, %v4323_v61  ;;  %vm721_vm7 = vweird.f32 %v4318_v11 }
 0x11a   : > { %v641_v33 = vmax.f32 %v627_v50, 0.0  ;;  %v625_v15 = vsub.f32 %v597_v29, %v4258_v7  ;;  %5433 = vst [vmem:[#allocation52_spill] sm:$0xff] %v4346_v52  ;;  %v4357_v29 = vmul.f32 %v4315_v12, %v4315_v12  ;;  %v4361_v7 = vmul.f32 %v4329_v53, %v4329_v53 }
 0x11b   : > { %v709_v27 = vsub.f32 1.5, %v708_v19  ;;  %v640_v19 = vmax.f32 %v626_v39, 0.0  ;;  %v5436_v12 = vsub.f32 %v3959_v9, %v4196_v59 }
 0x11c   : > { %v3307_v30 = vpop.eup %3306  ;;  %v4353_v51 = vadd.f32 1e-05, %v641_v33  ;;  %5434 = vst [vmem:[#allocation53_spill] sm:$0xff] %v4361_v7  ;;  %v639_v28 = vmax.f32 %v625_v15, 0.0 }
 0x11d   : > { %v3309_v55 = vpop.eup %3308  ;;  %v710_v3 = vmul.f32 %v3305_v45, %v709_v27  ;;  %v736_v50 = vmul.f32 %v3307_v30, %v4302_v56  ;;  %vm742_vm6 = vweird.f32 %v3307_v30  ;;  %v5435_v27 = vsub.f32 %v3956_v8, %v4196_v59 }
 0x11e   : > { %v3311_v44 = vpop.eup %3310  ;;  %v726_v33 = vmul.f32 %v3309_v55, %v4305_v40  ;;  %3312 = vrsqrt.f32 %v4353_v51  ;;  %vm732_vm8 = vweird.f32 %v3309_v55  ;;  %v572_v10 = vpop.xlane.xlu1 %571  ;;  %vm743_vm10 = vmor %vm741_vm3, %vm742_vm6  ;;  %v5440_v40 = vsub.f32 %v3995_v24, %v4229_v25 }
 0x11f   : > { %v714_v58 = vsel %vm713_vm4, %v3305_v45, %v710_v3  ;;  %v737_v43 = vmul.f32 %v3307_v30, %v736_v50  ;;  %v716_v53 = vmul.f32 %v3311_v44, %v4318_v11  ;;  %v4379_v50 = vadd.f32 1e-05, %v640_v19  ;;  %vm733_vm11 = vmor %vm731_vm5, %vm732_vm8  ;;  %v576_v24 = vpop.xlane.xlu2 %575 }
 0x120   : > { %v845_v39 = vmul.f32 %v714_v58, %v5435_v27  ;;  %v846_v61 = vmul.f32 %v714_v58, %v5436_v12  ;;  %v847_v52 = vmul.f32 %v714_v58, %v5437_v18  ;;  %v727_v15 = vmul.f32 %v3309_v55, %v726_v33 }
 0x121   : > { %v738_v45 = vmul.f32 0.5, %v737_v43  ;;  %v717_v3 = vmul.f32 %v3311_v44, %v716_v53  ;;  %vm722_vm9 = vweird.f32 %v3311_v44  ;;  %v4384_v12 = vadd.f32 1e-05, %v639_v28 }
 0x122   : > { %v895_v48 = vmul.f32 %v4237_v63, %v845_v39  ;;  %v896_v7 = vmul.f32 %v4239_v36, %v846_v61  ;;  %v897_v8 = vmul.f32 %v4244_v31, %v847_v52  ;;  %v728_v27 = vmul.f32 0.5, %v727_v15  ;;  %vm723_vm12 = vmor %vm721_vm7, %vm722_vm9 }
 0x123   : > { %v739_v2 = vsub.f32 1.5, %v738_v45  ;;  %v718_v9 = vmul.f32 0.5, %v717_v3  ;;  %3314 = vrsqrt.f32 %v4379_v50  ;;  %v5438_v3 = vsub.f32 %v3975_v16, %v4229_v25 }
 0x124   : > { %v4386_v59 = vpop.eup %3312  ;;  %v945_v18 = vadd.f32 %v4246_v62, %v895_v48  ;;  %v946_v53 = vadd.f32 %v4252_v54, %v896_v7  ;;  %v947_v43 = vadd.f32 %v4254_v23, %v897_v8  ;;  %v729_v58 = vsub.f32 1.5, %v728_v27 }
 0x125   : > { %v740_v19 = vmul.f32 %v3307_v30, %v739_v2  ;;  %v719_v61 = vsub.f32 1.5, %v718_v9  ;;  %v766_v52 = vmul.f32 %v4386_v59, %v4353_v51  ;;  %v4398_v48 = vmul.f32 %v572_v10, %v4191_v57 }
 0x126   : > { %v987_v33 = vpack.c.bf16 %v946_v53, %v945_v18  ;;  %v988_v28 = vpack.c.bf16 %v947_v43, %v947_v43  ;;  %v730_v39 = vmul.f32 %v3309_v55, %v729_v58  ;;  %3316 = vrsqrt.f32 %v4384_v12 }
 0x127   : > { %v744_v2 = vsel %vm743_vm10, %v3307_v30, %v740_v19  ;;  %v720_v7 = vmul.f32 %v3311_v44, %v719_v61  ;;  %v767_v15 = vmul.f32 %v4386_v59, %v766_v52  ;;  %v5439_v8 = vsub.f32 %v3978_v17, %v4229_v25 }
 0x128   : > { %1015 = vst [vmem:[#allocation2] sm:$0xff] %v987_v33  ;;  %v734_v45 = vsel %vm733_vm11, %v3309_v55, %v730_v39  ;;  %v854_v56 = vmul.f32 %v744_v2, %v5438_v3  ;;  %v856_v9 = vmul.f32 %v744_v2, %v5440_v40  ;;  %v5441_v30 = vsub.f32 %v3945_v4, %v4202_v47 }
 0x129   : > { %v855_v27 = vmul.f32 %v744_v2, %v5439_v8  ;;  %1016 = vst [vmem:[#allocation2 + $0x8] sm:$0xf] %v988_v28  ;;  %v5442_v16 = vsub.f32 %v3948_v5, %v4202_v47  ;;  %v5443_v17 = vsub.f32 %v3951_v6, %v4202_v47  ;;  %v724_v53 = vsel %vm723_vm12, %v3311_v44, %v720_v7  ;;  %v4432_v19 = vpop.eup %3314 }
 0x12a   : > { %v851_v55 = vmul.f32 %v734_v45, %v5441_v30  ;;  %v904_v25 = vmul.f32 %v4237_v63, %v854_v56  ;;  %v906_v43 = vmul.f32 %v4244_v31, %v856_v9  ;;  %v5444_v4 = vsub.f32 %v3984_v20, %v4242_v38 }
 0x12b   : > { %v852_v10 = vmul.f32 %v734_v45, %v5442_v16  ;;  %v853_v18 = vmul.f32 %v734_v45, %v5443_v17  ;;  %v905_v11 = vmul.f32 %v4239_v36, %v855_v27  ;;  %v5445_v47 = vsub.f32 %v3987_v21, %v4242_v38  ;;  %v568_v17 = vpop.xlane.xlu0 %567 }
 0x12c   : > { %v848_v58 = vmul.f32 %v724_v53, %v5444_v4  ;;  %v901_v5 = vmul.f32 %v4237_v63, %v851_v55  ;;  %v954_v52 = vadd.f32 %v4246_v62, %v904_v25  ;;  %v956_v28 = vadd.f32 %v4254_v23, %v906_v43  ;;  %v4447_v2 = vpop.eup %3316 }
 0x12d   : > { %v902_v61 = vmul.f32 %v4239_v36, %v852_v10  ;;  %v903_v6 = vmul.f32 %v4244_v31, %v853_v18  ;;  %v849_v44 = vmul.f32 %v724_v53, %v5445_v47  ;;  %v955_v33 = vadd.f32 %v4252_v54, %v905_v11  ;;  %v584_v11 = vpop.xlane.xlu1 %583 }
 0x12e   : > { %v5446_v20 = vsub.f32 %v4000_v26, %v4242_v38  ;;  %vm771_vm13 = vweird.f32 %v4353_v51  ;;  %v951_v7 = vadd.f32 %v4246_v62, %v901_v5  ;;  %v898_v3 = vmul.f32 %v4237_v63, %v848_v58 }
 0x12f   : > { %v952_v45 = vadd.f32 %v4252_v54, %v902_v61  ;;  %v953_v21 = vadd.f32 %v4254_v23, %v903_v6  ;;  %v993_v56 = vpack.c.bf16 %v955_v33, %v954_v52  ;;  %v994_v8 = vpack.c.bf16 %v956_v28, %v956_v28 }
 0x130   : > { %v850_v39 = vmul.f32 %v724_v53, %v5446_v20  ;;  %v899_v27 = vmul.f32 %v4239_v36, %v849_v44  ;;  %v948_v9 = vadd.f32 %v4246_v62, %v898_v3  ;;  %v756_v30 = vmul.f32 %v4432_v19, %v4379_v50  ;;  %v588_v44 = vpop.xlane.xlu2 %587 }
 0x131   : > { %v991_v26 = vpack.c.bf16 %v952_v45, %v951_v7  ;;  %v992_v38 = vpack.c.bf16 %v953_v21, %v953_v21  ;;  %1021 = vst [vmem:[#allocation2 + $0x24] sm:$0xff] %v993_v56  ;;  %vm761_vm14 = vweird.f32 %v4379_v50  ;;  %v768_v10 = vmul.f32 0.5, %v767_v15 }
 0x132   : > { %v900_v40 = vmul.f32 %v4244_v31, %v850_v39  ;;  %v949_v55 = vadd.f32 %v4252_v54, %v899_v27  ;;  %v757_v18 = vmul.f32 %v4432_v19, %v756_v30  ;;  %vm772_vm15 = vweird.f32 %v4386_v59  ;;  %1022 = vst [vmem:[#allocation2 + $0x2c] sm:$0xf] %v994_v8 }
 0x133   : > { %1019 = vst [vmem:[#allocation2 + $0x18] sm:$0xff] %v991_v26  ;;  %v746_v53 = vmul.f32 %v4447_v2, %v4384_v12  ;;  %v629_v25 = vsub.f32 %v4398_v48, %v4311_v49  ;;  %v769_v58 = vsub.f32 1.5, %v768_v10  ;;  %vm751_vm0 = vweird.f32 %v4384_v12  ;;  %vm773_vm2 = vmor %vm771_vm13, %vm772_vm15 }
 0x134   : > { %v950_v16 = vadd.f32 %v4254_v23, %v900_v40  ;;  %1020 = vst [vmem:[#allocation2 + $0x20] sm:$0xf] %v992_v38  ;;  %v989_v43 = vpack.c.bf16 %v949_v55, %v948_v9  ;;  %v602_v15 = vmul.f32 %v576_v24, %v4191_v57  ;;  %v758_v5 = vmul.f32 0.5, %v757_v18  ;;  %v580_v55 = vpop.xlane.xlu0 %579 }
 0x135   : > { %v747_v61 = vmul.f32 %v4447_v2, %v746_v53  ;;  %v643_v6 = vmax.f32 %v629_v25, 0.0  ;;  %v4471_v47 = vmul.f32 %v568_v17, %v4191_v57  ;;  %vm762_vm1 = vweird.f32 %v4432_v19 }
 0x136   : > { %v990_v4 = vpack.c.bf16 %v950_v16, %v950_v16  ;;  %1017 = vst [vmem:[#allocation2 + $0xc] sm:$0xff] %v989_v43  ;;  %v770_v49 = vmul.f32 %v4386_v59, %v769_v58  ;;  %v630_v48 = vsub.f32 %v602_v15, %v4350_v37  ;;  %v4477_v52 = vmul.f32 %v584_v11, %v4191_v57  ;;  %vm763_vm4 = vmor %vm761_vm14, %vm762_vm1 }
 0x137   : > { %v759_v24 = vsub.f32 1.5, %v758_v5  ;;  %v748_v33 = vmul.f32 0.5, %v747_v61  ;;  %vm752_vm3 = vweird.f32 %v4447_v2  ;;  %v4484_v28 = vadd.f32 1e-05, %v643_v6  ;;  %v5455_v61 = vld [vmem:[#allocation30_spill] sm:$0xff] }
 0x138   : > { %1018 = vst [vmem:[#allocation2 + $0x14] sm:$0xf] %v990_v4  ;;  %v774_v20 = vsel %vm773_vm2, %v4386_v59, %v770_v49  ;;  %v644_v39 = vmax.f32 %v630_v48, 0.0  ;;  %v628_v37 = vsub.f32 %v4471_v47, %v4342_v32  ;;  %v605_v7 = vmul.f32 %v588_v44, %v4191_v57  ;;  %vm753_vm5 = vmor %vm751_vm0, %vm752_vm3  ;;  %v5458_v48 = vld [vmem:[#allocation46_spill] sm:$0xff] }
 0x139   : > { %v760_v45 = vmul.f32 %v4432_v19, %v759_v24  ;;  %v5447_v21 = vsub.f32 %v4018_v34, %v4284_v42  ;;  %v5448_v3 = vsub.f32 %v4021_v35, %v4284_v42  ;;  %v5449_v8 = vsub.f32 %v4036_v41, %v4284_v42 }
 0x13a   : > { %v749_v32 = vsub.f32 1.5, %v748_v33  ;;  %3318 = vrsqrt.f32 %v4484_v28  ;;  %v4505_v27 = vadd.f32 1e-05, %v644_v39  ;;  %v632_v34 = vsub.f32 %v4477_v52, %v4357_v29 }
 0x13b   : > { %v863_v51 = vmul.f32 %v774_v20, %v5447_v21  ;;  %v864_v56 = vmul.f32 %v774_v20, %v5448_v3  ;;  %v865_v59 = vmul.f32 %v774_v20, %v5449_v8  ;;  %v764_v35 = vsel %vm763_vm4, %v4432_v19, %v760_v45  ;;  %v5459_v8 = vld [vmem:[#allocation52_spill] sm:$0xff] }
 0x13c   : > { %v5450_v50 = vsub.f32 %v3968_v13, %v4224_v46  ;;  %v5451_v38 = vsub.f32 %v3971_v14, %v4224_v46  ;;  %v5452_v30 = vsub.f32 %v3990_v22, %v4224_v46  ;;  %v750_v19 = vmul.f32 %v4447_v2, %v749_v32 }
 0x13d   : > { %v913_v40 = vmul.f32 %v4237_v63, %v863_v51  ;;  %v914_v41 = vmul.f32 %v4239_v36, %v864_v56  ;;  %v915_v42 = vmul.f32 %v4244_v31, %v865_v59  ;;  %3320 = vrsqrt.f32 %v4505_v27 }
 0x13e   : > { %v860_v26 = vmul.f32 %v764_v35, %v5450_v50  ;;  %v861_v9 = vmul.f32 %v764_v35, %v5451_v38  ;;  %v862_v29 = vmul.f32 %v764_v35, %v5452_v30  ;;  %v754_v46 = vsel %vm753_vm5, %v4447_v2, %v750_v19  ;;  %v592_v38 = vpop.xlane.xlu0 %591  ;;  %v5460_v30 = vld [vmem:[#allocation48_spill] sm:$0xff] }
 0x13f   : > { %v963_v16 = vadd.f32 %v4246_v62, %v913_v40  ;;  %v964_v10 = vadd.f32 %v4252_v54, %v914_v41  ;;  %v965_v17 = vadd.f32 %v4254_v23, %v915_v42  ;;  %v5453_v25 = vsub.f32 %v3934_v0, %v4199_v60 }
 0x140   : > { %v910_v13 = vmul.f32 %v4237_v63, %v860_v26  ;;  %v911_v14 = vmul.f32 %v4239_v36, %v861_v9  ;;  %v912_v22 = vmul.f32 %v4244_v31, %v862_v29  ;;  %v5454_v12 = vsub.f32 %v3937_v1, %v4199_v60  ;;  %v3319_v4 = vpop.eup %3318  ;;  %v5457_v1 = vld [vmem:[#allocation53_spill] sm:$0xff] }
 0x141   : > { %v999_v18 = vpack.c.bf16 %v964_v10, %v963_v16  ;;  %v1000_v53 = vpack.c.bf16 %v965_v17, %v965_v17  ;;  %v857_v11 = vmul.f32 %v754_v46, %v5453_v25  ;;  %v5456_v2 = vsub.f32 %v5455_v61, %v4199_v60  ;;  %v5461_v29 = vld [vmem:[#allocation33_spill] sm:$0xff]  ;;  %v5462_v16 = vld [vmem:[#allocation34_spill] sm:$0xff]  ;;  %v5469_v61 = vld [vmem:[#allocation35_spill] sm:$0xff] }
 0x142   : > { %v858_v43 = vmul.f32 %v754_v46, %v5454_v12  ;;  %v960_v58 = vadd.f32 %v4246_v62, %v910_v13  ;;  %v961_v15 = vadd.f32 %v4252_v54, %v911_v14  ;;  %v962_v5 = vadd.f32 %v4254_v23, %v912_v22  ;;  %v5463_v22 = vld [vmem:[#allocation36_spill] sm:$0xff]  ;;  %v5465_v12 = vld [vmem:[#allocation47_spill] sm:$0xff] }
 0x143   : > { %v859_v6 = vmul.f32 %v754_v46, %v5456_v2  ;;  %1027 = vst [vmem:[#allocation2 + $0x48] sm:$0xff] %v999_v18  ;;  %v907_v47 = vmul.f32 %v4237_v63, %v857_v11  ;;  %v786_v44 = vmul.f32 %v3319_v4, %v4484_v28  ;;  %v633_v49 = vsub.f32 %v605_v7, %v5457_v1  ;;  %v3321_v60 = vpop.eup %3320  ;;  %v5473_v1 = vld [vmem:[#allocation40_spill] sm:$0xff] }
 0x144   : > { %v908_v0 = vmul.f32 %v4239_v36, %v858_v43  ;;  %v4553_v52 = vmul.f32 %v4191_v57, %v5458_v48  ;;  %v997_v24 = vpack.c.bf16 %v961_v15, %v960_v58  ;;  %v998_v33 = vpack.c.bf16 %v962_v5, %v962_v5  ;;  %1028 = vst [vmem:[#allocation2 + $0x50] sm:$0xf] %v1000_v53  ;;  %v5474_v48 = vld [vmem:[#allocation42_spill] sm:$0xff] }
 0x145   : > { %v909_v20 = vmul.f32 %v4244_v31, %v859_v6  ;;  %v957_v39 = vadd.f32 %v4246_v62, %v907_v47  ;;  %v787_v21 = vmul.f32 %v3319_v4, %v786_v44  ;;  %v642_v51 = vmax.f32 %v628_v37, 0.0  ;;  %v5472_v44 = vld [vmem:[#allocation39_spill] sm:$0xff] }
 0x146   : > { %v958_v45 = vadd.f32 %v4252_v54, %v908_v0  ;;  %1025 = vst [vmem:[#allocation2 + $0x3c] sm:$0xff] %v997_v24  ;;  %v796_v7 = vmul.f32 %v3321_v60, %v4505_v27  ;;  %v646_v56 = vmax.f32 %v632_v34, 0.0  ;;  %v617_v59 = vmul.f32 %v5459_v8, %v5459_v8 }
 0x147   : > { %v959_v3 = vadd.f32 %v4254_v23, %v909_v20  ;;  %1026 = vst [vmem:[#allocation2 + $0x44] sm:$0xf] %v998_v33  ;;  %v788_v35 = vmul.f32 0.5, %v787_v21  ;;  %v4562_v40 = vadd.f32 1e-05, %v642_v51  ;;  %v647_v41 = vmax.f32 %v633_v49, 0.0 }
 0x148   : > { %v995_v32 = vpack.c.bf16 %v958_v45, %v957_v39  ;;  %v797_v50 = vmul.f32 %v3321_v60, %v796_v7  ;;  %v4564_v26 = vadd.f32 1e-05, %v646_v56  ;;  %v603_v37 = vmul.f32 %v580_v55, %v4191_v57 }
 0x149   : > { %v996_v42 = vpack.c.bf16 %v959_v3, %v959_v3  ;;  %v789_v9 = vsub.f32 1.5, %v788_v35  ;;  %vm792_vm6 = vweird.f32 %v3319_v4  ;;  %3322 = vrsqrt.f32 %v4562_v40 }
 0x14a   : > { %1023 = vst [vmem:[#allocation2 + $0x30] sm:$0xff] %v995_v32  ;;  %v4568_v34 = vadd.f32 1e-05, %v647_v41  ;;  %v670_v19 = vsub.f32 %v5461_v29, %v5460_v30  ;;  %v671_v10 = vsub.f32 %v5462_v16, %v5460_v30  ;;  %v798_v17 = vmul.f32 0.5, %v797_v50 }
 0x14b   : > { %1024 = vst [vmem:[#allocation2 + $0x38] sm:$0xf] %v996_v42  ;;  %v631_v13 = vsub.f32 %v603_v37, %v617_v59  ;;  %v790_v14 = vmul.f32 %v3319_v4, %v789_v9  ;;  %vm791_vm7 = vweird.f32 %v4484_v28  ;;  %3324 = vrsqrt.f32 %v4564_v26  ;;  %v5464_v28 = vld [vmem:[#allocation31_spill] sm:$0xff] }
 0x14c   : > { %v606_v55 = vmul.f32 %v592_v38, %v4191_v57  ;;  %v672_v46 = vsub.f32 %v5463_v22, %v5460_v30  ;;  %vm793_vm8 = vmor %vm791_vm7, %vm792_vm6  ;;  %v799_v18 = vsub.f32 1.5, %v798_v17  ;;  %vm802_vm9 = vweird.f32 %v3321_v60  ;;  %v5467_v57 = vld [vmem:[#allocation32_spill] sm:$0xff] }
 0x14d   : > { %v620_v53 = vmul.f32 %v4553_v52, %v4553_v52  ;;  %v794_v25 = vsel %vm793_vm8, %v3319_v4, %v790_v14  ;;  %vm801_vm10 = vweird.f32 %v4505_v27  ;;  %3326 = vrsqrt.f32 %v4568_v34  ;;  %v5471_v4 = vld [vmem:[#allocation50_spill] sm:$0xff] }
 0x14e   : > { %v645_v11 = vmax.f32 %v631_v13, 0.0  ;;  %v5466_v43 = vsub.f32 %v5464_v28, %v5465_v12  ;;  %v5468_v15 = vsub.f32 %v5467_v57, %v5465_v12  ;;  %v5470_v2 = vsub.f32 %v5469_v61, %v5465_v12  ;;  %vm803_vm11 = vmor %vm801_vm10, %vm802_vm9  ;;  %v5475_v28 = vld [vmem:[#allocation49_spill] sm:$0xff] }
 0x14f   : > { %v800_v47 = vmul.f32 %v3321_v60, %v799_v18  ;;  %v3323_v0 = vpop.eup %3322  ;;  %v676_v27 = vsub.f32 %v5472_v44, %v5471_v4  ;;  %v677_v49 = vsub.f32 %v5473_v1, %v5471_v4  ;;  %v678_v24 = vsub.f32 %v5474_v48, %v5471_v4  ;;  %v5476_v12 = vld [vmem:[#allocation37_spill] sm:$0xff]  ;;  %v5480_v48 = vld [vmem:[#allocation43_spill] sm:$0xff] }
 0x150   : > { %v869_v58 = vmul.f32 %v794_v25, %v5466_v43  ;;  %v870_v5 = vmul.f32 %v794_v25, %v5468_v15  ;;  %v871_v6 = vmul.f32 %v794_v25, %v5470_v2  ;;  %v634_v33 = vsub.f32 %v606_v55, %v620_v53  ;;  %v5477_v2 = vld [vmem:[#allocation38_spill] sm:$0xff] }
 0x151   : > { %v804_v21 = vsel %vm803_vm11, %v3321_v60, %v800_v47  ;;  %v4601_v51 = vpop.eup %3324  ;;  %v776_v59 = vmul.f32 %v3323_v0, %v4562_v40  ;;  %v4607_v42 = vadd.f32 1e-05, %v645_v11  ;;  %v682_v43 = vsub.f32 %v5476_v12, %v5475_v28 }
 0x152   : > { %v919_v20 = vmul.f32 %v4237_v63, %v869_v58  ;;  %v920_v39 = vmul.f32 %v4239_v36, %v870_v5  ;;  %v921_v45 = vmul.f32 %v4244_v31, %v871_v6  ;;  %v872_v3 = vmul.f32 %v804_v21, %v676_v27  ;;  %v5478_v27 = vld [vmem:[#allocation41_spill] sm:$0xff] }
 0x153   : > { %v873_v7 = vmul.f32 %v804_v21, %v677_v49  ;;  %v874_v56 = vmul.f32 %v804_v21, %v678_v24  ;;  %v4609_v50 = vpop.eup %3326  ;;  %v777_v9 = vmul.f32 %v3323_v0, %v776_v59  ;;  %v816_v14 = vmul.f32 %v4601_v51, %v4564_v26  ;;  %v5479_v49 = vld [vmem:[#allocation51_spill] sm:$0xff] }
 0x154   : > { %v969_v32 = vadd.f32 %v4246_v62, %v919_v20  ;;  %v970_v35 = vadd.f32 %v4252_v54, %v920_v39  ;;  %v971_v41 = vadd.f32 %v4254_v23, %v921_v45  ;;  %v922_v37 = vmul.f32 %v4237_v63, %v872_v3  ;;  %v5481_v20 = vld [vmem:[#allocation44_spill] sm:$0xff]  ;;  %v5482_v3 = vld [vmem:[#allocation45_spill] sm:$0xff] }
 0x155   : > { %v923_v60 = vmul.f32 %v4239_v36, %v873_v7  ;;  %v924_v38 = vmul.f32 %v4244_v31, %v874_v56  ;;  %v648_v55 = vmax.f32 %v634_v33, 0.0  ;;  %v778_v11 = vmul.f32 0.5, %v777_v9 }
 0x156   : > { %v1003_v17 = vpack.c.bf16 %v970_v35, %v969_v32  ;;  %v1004_v13 = vpack.c.bf16 %v971_v41, %v971_v41  ;;  %v972_v18 = vadd.f32 %v4246_v62, %v922_v37  ;;  %v817_v58 = vmul.f32 %v4601_v51, %v816_v14 }
 0x157   : > { %v973_v53 = vadd.f32 %v4252_v54, %v923_v60  ;;  %v974_v25 = vadd.f32 %v4254_v23, %v924_v38  ;;  %v826_v57 = vmul.f32 %v4609_v50, %v4568_v34  ;;  %3328 = vrsqrt.f32 %v4607_v42 }
 0x158   : > { %1031 = vst [vmem:[#allocation2 + $0x60] sm:$0xff] %v1003_v17  ;;  %v779_v61 = vsub.f32 1.5, %v778_v11  ;;  %vm782_vm12 = vweird.f32 %v3323_v0  ;;  %v683_v6 = vsub.f32 %v5477_v2, %v5475_v28  ;;  %v818_v47 = vmul.f32 0.5, %v817_v58 }
 0x159   : > { %1032 = vst [vmem:[#allocation2 + $0x68] sm:$0xf] %v1004_v13  ;;  %v1005_v15 = vpack.c.bf16 %v973_v53, %v972_v18  ;;  %v1006_v5 = vpack.c.bf16 %v974_v25, %v974_v25  ;;  %v827_v4 = vmul.f32 %v4609_v50, %v826_v57  ;;  %v4628_v44 = vadd.f32 1e-05, %v648_v55 }
 0x15a   : > { %v684_v1 = vsub.f32 %v5478_v27, %v5475_v28  ;;  %v685_v24 = vsub.f32 %v5480_v48, %v5479_v49  ;;  %v780_v33 = vmul.f32 %v3323_v0, %v779_v61  ;;  %vm781_vm13 = vweird.f32 %v4562_v40 }
 0x15b   : > { %1033 = vst [vmem:[#allocation2 + $0x6c] sm:$0xff] %v1005_v15  ;;  %v686_v39 = vsub.f32 %v5481_v20, %v5479_v49  ;;  %vm783_vm14 = vmor %vm781_vm13, %vm782_vm12  ;;  %v819_v45 = vsub.f32 1.5, %v818_v47  ;;  %vm822_vm15 = vweird.f32 %v4601_v51  ;;  %v828_v21 = vmul.f32 0.5, %v827_v4  ;;  %v3332_v20 = vld [vmem:[%s3906_s9 + $0xf0] sm:$0xff] }
 0x15c   : > { %1034 = vst [vmem:[#allocation2 + $0x74] sm:$0xf] %v1006_v5  ;;  %v687_v7 = vsub.f32 %v5482_v3, %v5479_v49  ;;  %v784_v56 = vsel %vm783_vm14, %v3323_v0, %v780_v33  ;;  %vm821_vm0 = vweird.f32 %v4564_v26  ;;  %3330 = vrsqrt.f32 %v4628_v44  ;;  %v3334_v3 = vld [vmem:[%s3906_s9 + $0x100] sm:$0xff] }
 0x15d   : > { %v4642_v59 = vpop.eup %3328  ;;  %v866_v40 = vmul.f32 %v784_v56, %v670_v19  ;;  %v867_v32 = vmul.f32 %v784_v56, %v671_v10  ;;  %v868_v35 = vmul.f32 %v784_v56, %v672_v46  ;;  %v820_v0 = vmul.f32 %v4601_v51, %v819_v45  ;;  %vm823_vm1 = vmor %vm821_vm0, %vm822_vm15  ;;  %v3333_v45 = vld [vmem:[%s3906_s9 + $0xf8] sm:$0xff] }
 0x15e   : > { %v829_v26 = vsub.f32 1.5, %v828_v21  ;;  %vm831_vm2 = vweird.f32 %v4568_v34  ;;  %vm832_vm3 = vweird.f32 %v4609_v50  ;;  %v806_v29 = vmul.f32 %v4642_v59, %v4607_v42 }
 0x15f   : > { %v916_v19 = vmul.f32 %v4237_v63, %v866_v40  ;;  %v917_v16 = vmul.f32 %v4239_v36, %v867_v32  ;;  %v918_v10 = vmul.f32 %v4244_v31, %v868_v35  ;;  %v824_v30 = vsel %vm823_vm1, %v4601_v51, %v820_v0  ;;  %vm833_vm4 = vmor %vm831_vm2, %vm832_vm3 }
 0x160   : > { %v878_v22 = vmul.f32 %v824_v30, %v682_v43  ;;  %v879_v46 = vmul.f32 %v824_v30, %v683_v6  ;;  %v880_v41 = vmul.f32 %v824_v30, %v684_v1  ;;  %v830_v37 = vmul.f32 %v4609_v50, %v829_v26 }
 0x161   : > { %v966_v34 = vadd.f32 %v4246_v62, %v916_v19  ;;  %v967_v60 = vadd.f32 %v4252_v54, %v917_v16  ;;  %v968_v38 = vadd.f32 %v4254_v23, %v918_v10  ;;  %v807_v9 = vmul.f32 %v4642_v59, %v806_v29  ;;  %v3336_v10 = vld [vmem:[%s3906_s9 + $0x140] sm:$0xff] }
 0x162   : > { %v4667_v17 = vpop.eup %3330  ;;  %v928_v13 = vmul.f32 %v4237_v63, %v878_v22  ;;  %v929_v51 = vmul.f32 %v4239_v36, %v879_v46  ;;  %v930_v14 = vmul.f32 %v4244_v31, %v880_v41  ;;  %v834_v55 = vsel %vm833_vm4, %v4609_v50, %v830_v37  ;;  %v3337_v22 = vld [vmem:[%s3906_s9 + $0x148] sm:$0xff] }
 0x163   : > { %v1001_v18 = vpack.c.bf16 %v967_v60, %v966_v34  ;;  %v1002_v53 = vpack.c.bf16 %v968_v38, %v968_v38  ;;  %v881_v25 = vmul.f32 %v834_v55, %v685_v24  ;;  %v882_v11 = vmul.f32 %v834_v55, %v686_v39 }
 0x164   : > { %v978_v28 = vadd.f32 %v4246_v62, %v928_v13  ;;  %v979_v12 = vadd.f32 %v4252_v54, %v929_v51  ;;  %v980_v43 = vadd.f32 %v4254_v23, %v930_v14  ;;  %v883_v58 = vmul.f32 %v834_v55, %v687_v7 }
 0x165   : > { %1029 = vst [vmem:[#allocation2 + $0x54] sm:$0xff] %v1001_v18  ;;  %v931_v57 = vmul.f32 %v4237_v63, %v881_v25  ;;  %v932_v15 = vmul.f32 %v4239_v36, %v882_v11  ;;  %v808_v5 = vmul.f32 0.5, %v807_v9  ;;  %v836_v50 = vmul.f32 %v4667_v17, %v4628_v44 }
 0x166   : > { %1030 = vst [vmem:[#allocation2 + $0x5c] sm:$0xf] %v1002_v53  ;;  %v1009_v61 = vpack.c.bf16 %v979_v12, %v978_v28  ;;  %v1010_v2 = vpack.c.bf16 %v980_v43, %v980_v43  ;;  %v933_v6 = vmul.f32 %v4244_v31, %v883_v58  ;;  %vm812_vm5 = vweird.f32 %v4642_v59 }
 0x167   : > { %v981_v47 = vadd.f32 %v4246_v62, %v931_v57  ;;  %v982_v4 = vadd.f32 %v4252_v54, %v932_v15  ;;  %v809_v27 = vsub.f32 1.5, %v808_v5  ;;  %v837_v1 = vmul.f32 %v4667_v17, %v836_v50 }
 0x168   : > { %1037 = vst [vmem:[#allocation2 + $0x84] sm:$0xff] %v1009_v61  ;;  %v983_v49 = vadd.f32 %v4254_v23, %v933_v6  ;;  %vm811_vm6 = vweird.f32 %v4607_v42  ;;  %v679_v39 = vsub.f32 %v3332_v20, %v5459_v8  ;;  %v680_v21 = vsub.f32 %v3333_v45, %v5459_v8 }
 0x169   : > { %1038 = vst [vmem:[#allocation2 + $0x8c] sm:$0xf] %v1010_v2  ;;  %v1011_v48 = vpack.c.bf16 %v982_v4, %v981_v47  ;;  %v810_v24 = vmul.f32 %v4642_v59, %v809_v27  ;;  %v838_v33 = vmul.f32 0.5, %v837_v1  ;;  %v681_v7 = vsub.f32 %v3334_v3, %v5459_v8  ;;  %vm813_vm7 = vmor %vm811_vm6, %vm812_vm5  ;;  %v3335_v8 = vld [vmem:[%s3906_s9 + $0x138] sm:$0xff] }
 0x16a   : > { %v1012_v56 = vpack.c.bf16 %v983_v49, %v983_v49  ;;  %vm842_vm8 = vweird.f32 %v4667_v17  ;;  %vm841_vm9 = vweird.f32 %v4628_v44  ;;  %v688_v29 = vsub.f32 %v3335_v8, %v4553_v52 }
 0x16b   : > { %1039 = vst [vmem:[#allocation2 + $0x90] sm:$0xff] %v1011_v48  ;;  %v814_v40 = vsel %vm813_vm7, %v4642_v59, %v810_v24  ;;  %v839_v42 = vsub.f32 1.5, %v838_v33  ;;  %vm843_vm10 = vmor %vm841_vm9, %vm842_vm8  ;;  %v689_v30 = vsub.f32 %v3336_v10, %v4553_v52  ;;  %v690_v46 = vsub.f32 %v3337_v22, %v4553_v52 }
 0x16c   : > { %1040 = vst [vmem:[#allocation2 + $0x98] sm:$0xf] %v1012_v56  ;;  %v875_v32 = vmul.f32 %v814_v40, %v679_v39  ;;  %v876_v35 = vmul.f32 %v814_v40, %v680_v21  ;;  %v877_v0 = vmul.f32 %v814_v40, %v681_v7 }
 0x16d   : > { %v840_v26 = vmul.f32 %v4667_v17, %v839_v42 }
 0x16e   : > { %v925_v19 = vmul.f32 %v4237_v63, %v875_v32  ;;  %v926_v16 = vmul.f32 %v4239_v36, %v876_v35  ;;  %v927_v59 = vmul.f32 %v4244_v31, %v877_v0 }
 0x16f   : > { %v844_v41 = vsel %vm843_vm10, %v4667_v17, %v840_v26 }
 0x170   : > { %v975_v44 = vadd.f32 %v4246_v62, %v925_v19  ;;  %v976_v37 = vadd.f32 %v4252_v54, %v926_v16  ;;  %v977_v34 = vadd.f32 %v4254_v23, %v927_v59  ;;  %v884_v60 = vmul.f32 %v844_v41, %v688_v29 }
 0x171   : > { %v885_v38 = vmul.f32 %v844_v41, %v689_v30  ;;  %v886_v9 = vmul.f32 %v844_v41, %v690_v46 }
 0x172   : > { %v1007_v13 = vpack.c.bf16 %v976_v37, %v975_v44  ;;  %v1008_v51 = vpack.c.bf16 %v977_v34, %v977_v34  ;;  %v934_v14 = vmul.f32 %v4237_v63, %v884_v60 }
 0x173   : > { %v935_v55 = vmul.f32 %v4239_v36, %v885_v38  ;;  %v936_v18 = vmul.f32 %v4244_v31, %v886_v9 }
 0x174   : > { %1035 = vst [vmem:[#allocation2 + $0x78] sm:$0xff] %v1007_v13  ;;  %v984_v52 = vadd.f32 %v4246_v62, %v934_v14 }
 0x175   : > { %1036 = vst [vmem:[#allocation2 + $0x80] sm:$0xf] %v1008_v51  ;;  %v985_v17 = vadd.f32 %v4252_v54, %v935_v55  ;;  %v986_v53 = vadd.f32 %v4254_v23, %v936_v18 }
 0x177   : > { %v1013_v25 = vpack.c.bf16 %v985_v17, %v984_v52  ;;  %v1014_v11 = vpack.c.bf16 %v986_v53, %v986_v53 }
 0x179   : > { %1041 = vst [vmem:[#allocation2 + $0x9c] sm:$0xff] %v1013_v25 }
 0x17a   : > { %1042 = vst [vmem:[#allocation2 + $0xa4] sm:$0xf] %v1014_v11 }
 0x17b PF: > { %v2735_v31 = vld [vmem:[%s3918_s18 + $0xe0] sm:$0xf]  ;;  %v3061_v54 = vld [vmem:[%s3918_s18 + $0xec] sm:$0xf0]  ;;  %v3059_v58 = vld [vmem:[%s3918_s18 + $0xe4] sm:$0xf] }
 0x17c   : > { %v2863_v23 = vld [vmem:[%s3918_s18 + $0x1e0] sm:$0xf]  ;;  %v2736_v63 = vor.u32 %v3061_v54, %v2735_v31  ;;  %v3093_v36 = vld [vmem:[%s3918_s18 + $0x1ec] sm:$0xf0]  ;;  %v2737_v57 = vld [vmem:[%s3918_s18 + $0xf0] sm:$0xf0] }
 0x17d   : > { %v2991_v62 = vld [vmem:[%s3918_s18 + $0x2e0] sm:$0xf]  ;;  %v3125_v28 = vld [vmem:[%s3918_s18 + $0x2ec] sm:$0xf0]  ;;  %v2864_v12 = vor.u32 %v3093_v36, %v2863_v23  ;;  %v2740_v5 = vor.u32 %v3059_v58, %v2737_v57  ;;  %v3055_v1 = vld [vmem:[%s3918_s18 + $0xc4] sm:$0xf] }
 0x17e   : > { %v2992_v43 = vor.u32 %v3125_v28, %v2991_v62  ;;  %v2719_v15 = vld [vmem:[%s3918_s18 + $0xc0] sm:$0xf]  ;;  %1769 = vmatpush.bf16.msra.mxu0 %v2736_v63  ;;  %v3057_v50 = vld [vmem:[%s3918_s18 + $0xcc] sm:$0xf0]  ;;  %v2721_v48 = vld [vmem:[%s3918_s18 + $0xd0] sm:$0xf0] }
 0x17f   : > { %v2847_v61 = vld [vmem:[%s3918_s18 + $0x1c0] sm:$0xf]  ;;  %v3089_v2 = vld [vmem:[%s3918_s18 + $0x1cc] sm:$0xf0]  ;;  %1813 = vmatpush.bf16.msra.mxu1 %v2864_v12  ;;  %v2720_v6 = vor.u32 %v3057_v50, %v2719_v15  ;;  %1901 = vmatpush.bf16.msra.mxu3 %v2740_v5  ;;  %v2724_v20 = vor.u32 %v3055_v1, %v2721_v48  ;;  %v3051_v56 = vld [vmem:[%s3918_s18 + $0xa4] sm:$0xf] }
 0x180   : > { %1857 = vmatpush.bf16.msra.mxu2 %v2992_v43  ;;  %v2848_v47 = vor.u32 %v3089_v2, %v2847_v61  ;;  %v2975_v4 = vld [vmem:[%s3918_s18 + $0x2c0] sm:$0xf]  ;;  %v3121_v27 = vld [vmem:[%s3918_s18 + $0x2cc] sm:$0xf0]  ;;  %v2705_v40 = vld [vmem:[%s3918_s18 + $0xb0] sm:$0xf0] }
 0x181   : > { %v2976_v49 = vor.u32 %v3121_v27, %v2975_v4  ;;  %v2703_v24 = vld [vmem:[%s3918_s18 + $0xa0] sm:$0xf]  ;;  %v3053_v33 = vld [vmem:[%s3918_s18 + $0xac] sm:$0xf0]  ;;  %v2708_v8 = vor.u32 %v3051_v56, %v2705_v40  ;;  %v3047_v59 = vld [vmem:[%s3918_s18 + $0x84] sm:$0xf] }
 0x182   : > { %v2831_v39 = vld [vmem:[%s3918_s18 + $0x1a0] sm:$0xf]  ;;  %v3085_v45 = vld [vmem:[%s3918_s18 + $0x1ac] sm:$0xf0]  ;;  %1770 = vmatpush.bf16.msra.mxu0 %v2720_v6  ;;  %v2704_v3 = vor.u32 %v3053_v33, %v2703_v24  ;;  %v2689_v10 = vld [vmem:[%s3918_s18 + $0x90] sm:$0xf0] }
 0x183   : > { %v2959_v21 = vld [vmem:[%s3918_s18 + $0x2a0] sm:$0xf]  ;;  %v3117_v7 = vld [vmem:[%s3918_s18 + $0x2ac] sm:$0xf0]  ;;  %1814 = vmatpush.bf16.msra.mxu1 %v2848_v47  ;;  %v2832_v42 = vor.u32 %v3085_v45, %v2831_v39  ;;  %1902 = vmatpush.bf16.msra.mxu3 %v2724_v20  ;;  %v2692_v34 = vor.u32 %v3047_v59, %v2689_v10  ;;  %v3043_v13 = vld [vmem:[%s3918_s18 + $0x64] sm:$0xf] }
 0x184   : > { %1858 = vmatpush.bf16.msra.mxu2 %v2976_v49  ;;  %v2960_v32 = vor.u32 %v3117_v7, %v2959_v21  ;;  %v2687_v35 = vld [vmem:[%s3918_s18 + $0x80] sm:$0xf]  ;;  %v3049_v0 = vld [vmem:[%s3918_s18 + $0x8c] sm:$0xf0]  ;;  %v2673_v51 = vld [vmem:[%s3918_s18 + $0x70] sm:$0xf0] }
 0x185   : > { %v2815_v26 = vld [vmem:[%s3918_s18 + $0x180] sm:$0xf]  ;;  %v3081_v29 = vld [vmem:[%s3918_s18 + $0x18c] sm:$0xf0]  ;;  %v2688_v30 = vor.u32 %v3049_v0, %v2687_v35  ;;  %v2676_v25 = vor.u32 %v3043_v13, %v2673_v51  ;;  %v3039_v23 = vld [vmem:[%s3918_s18 + $0x44] sm:$0xf] }
 0x186   : > { %v2943_v19 = vld [vmem:[%s3918_s18 + $0x280] sm:$0xf]  ;;  %v3113_v16 = vld [vmem:[%s3918_s18 + $0x28c] sm:$0xf0]  ;;  %1771 = vmatpush.bf16.msra.mxu0 %v2704_v3  ;;  %v2816_v22 = vor.u32 %v3081_v29, %v2815_v26  ;;  %v2657_v63 = vld [vmem:[%s3918_s18 + $0x50] sm:$0xf0] }
 0x187   : > { %1815 = vmatpush.bf16.msra.mxu1 %v2832_v42  ;;  %v2944_v46 = vor.u32 %v3113_v16, %v2943_v19  ;;  %v2671_v41 = vld [vmem:[%s3918_s18 + $0x60] sm:$0xf]  ;;  %v3045_v44 = vld [vmem:[%s3918_s18 + $0x6c] sm:$0xf0]  ;;  %1903 = vmatpush.bf16.msra.mxu3 %v2708_v8  ;;  %v2660_v57 = vor.u32 %v3039_v23, %v2657_v63  ;;  %v3035_v61 = vld [vmem:[%s3918_s18 + $0x24] sm:$0xf] }
 0x188   : > { %1859 = vmatpush.bf16.msra.mxu2 %v2960_v32  ;;  %v2799_v37 = vld [vmem:[%s3918_s18 + $0x160] sm:$0xf]  ;;  %v3077_v60 = vld [vmem:[%s3918_s18 + $0x16c] sm:$0xf0]  ;;  %v2672_v14 = vor.u32 %v3045_v44, %v2671_v41  ;;  %v2641_v2 = vld [vmem:[%s3918_s18 + $0x30] sm:$0xf0] }
 0x189   : > { %v2927_v38 = vld [vmem:[%s3918_s18 + $0x260] sm:$0xf]  ;;  %v3109_v9 = vld [vmem:[%s3918_s18 + $0x26c] sm:$0xf0]  ;;  %v2800_v55 = vor.u32 %v3077_v60, %v2799_v37  ;;  %v2644_v20 = vor.u32 %v3035_v61, %v2641_v2  ;;  %v3031_v39 = vld [vmem:[%s3918_s18 + $0x4] sm:$0xf] }
 0x18a   : > { %1772 = vmatpush.bf16.msra.mxu0 %v2688_v30  ;;  %v2928_v18 = vor.u32 %v3109_v9, %v2927_v38  ;;  %v2655_v52 = vld [vmem:[%s3918_s18 + $0x40] sm:$0xf]  ;;  %v3041_v17 = vld [vmem:[%s3918_s18 + $0x4c] sm:$0xf0]  ;;  %v2625_v45 = vld [vmem:[%s3918_s18 + $0x10] sm:$0xf0] }
 0x18b   : > { %1816 = vmatpush.bf16.msra.mxu1 %v2816_v22  ;;  %v2783_v53 = vld [vmem:[%s3918_s18 + $0x140] sm:$0xf]  ;;  %1904 = vmatpush.bf16.msra.mxu3 %v2692_v34  ;;  %v3073_v11 = vld [vmem:[%s3918_s18 + $0x14c] sm:$0xf0]  ;;  %v2656_v36 = vor.u32 %v3041_v17, %v2655_v52  ;;  %v3011_v3 = vld [vmem:[#allocation2 + $0x8] sm:$0xf0]  ;;  %v2628_v16 = vor.u32 %v3031_v39, %v2625_v45 }
 0x18c   : > { %1860 = vmatpush.bf16.msra.mxu2 %v2944_v46  ;;  %v2911_v31 = vld [vmem:[%s3918_s18 + $0x240] sm:$0xf]  ;;  %v3105_v54 = vld [vmem:[%s3918_s18 + $0x24c] sm:$0xf0]  ;;  %v2784_v62 = vor.u32 %v3073_v11, %v2783_v53  ;;  %v2743_v7 = vld [vmem:[%s3918_s18 + $0xe8] sm:$0xf] }
 0x18d   : > { %v2912_v28 = vor.u32 %v3105_v54, %v2911_v31  ;;  %v2639_v12 = vld [vmem:[%s3918_s18 + $0x20] sm:$0xf]  ;;  %v3037_v43 = vld [vmem:[%s3918_s18 + $0x2c] sm:$0xf0]  ;;  %v3062_v56 = vld [vmem:[%s3918_s18 + $0xf4] sm:$0xf0] }
 0x18e   : > { %1773 = vmatpush.bf16.msra.mxu0 %v2672_v14  ;;  %v2767_v58 = vld [vmem:[%s3918_s18 + $0x120] sm:$0xf]  ;;  %v3069_v15 = vld [vmem:[%s3918_s18 + $0x12c] sm:$0xf0]  ;;  %v2640_v6 = vor.u32 %v3037_v43, %v2639_v12  ;;  %v3010_v42 = vld [vmem:[#allocation2 + $0x4] sm:$0xf]  ;;  %v2744_v59 = vor.u32 %v3062_v56, %v2743_v7 }
 0x18f   : > { %1817 = vmatpush.bf16.msra.mxu1 %v2800_v55  ;;  %1905 = vmatpush.bf16.msra.mxu3 %v2676_v25  ;;  %v2895_v5 = vld [vmem:[%s3918_s18 + $0x220] sm:$0xf]  ;;  %v3101_v50 = vld [vmem:[%s3918_s18 + $0x22c] sm:$0xf0]  ;;  %v2768_v1 = vor.u32 %v3069_v15, %v2767_v58  ;;  %v2871_v32 = vld [vmem:[%s3918_s18 + $0x1e8] sm:$0xf] }
 0x190   : > { %1861 = vmatpush.bf16.msra.mxu2 %v2928_v18  ;;  %v2623_v47 = vld [vmem:[%s3918_s18] sm:$0xf]  ;;  %v3033_v4 = vld [vmem:[%s3918_s18 + $0xc] sm:$0xf0]  ;;  %v2896_v49 = vor.u32 %v3101_v50, %v2895_v5  ;;  %v3094_v35 = vld [vmem:[%s3918_s18 + $0x1f4] sm:$0xf0] }
 0x191   : > { %v2751_v27 = vld [vmem:[%s3918_s18 + $0x100] sm:$0xf]  ;;  %v3065_v48 = vld [vmem:[%s3918_s18 + $0x10c] sm:$0xf0]  ;;  %v2624_v40 = vor.u32 %v3033_v4, %v2623_v47  ;;  %v2547_v29 = vld [vmem:[#allocation2 + $0x8] sm:$0xf]  ;;  %v2872_v41 = vor.u32 %v3094_v35, %v2871_v32 }
 0x192   : > { %1774 = vmatpush.bf16.msra.mxu0 %v2656_v36  ;;  %v2879_v24 = vld [vmem:[%s3918_s18 + $0x200] sm:$0xf]  ;;  %v3097_v33 = vld [vmem:[%s3918_s18 + $0x20c] sm:$0xf0]  ;;  %v2752_v0 = vor.u32 %v3065_v48, %v2751_v27  ;;  %v3012_v19 = vld [vmem:[#allocation2 + $0x10] sm:$0xf0] }
 0x193   : > { %1818 = vmatpush.bf16.msra.mxu1 %v2784_v62  ;;  %1906 = vmatpush.bf16.msra.mxu3 %v2660_v57  ;;  %v2539_v21 = vld [vmem:[#allocation2] sm:$0xf]  ;;  %v2880_v26 = vor.u32 %v3097_v33, %v2879_v24  ;;  %v2541_v8 = vld [vmem:[#allocation2 + $0xc] sm:$0xf0]  ;;  %v3123_v10 = vld [vmem:[%s3918_s18 + $0x2e4] sm:$0xf]  ;;  %v4797_v38 = vor.u32 %v3012_v19, %v2547_v29 }
 0x194   : > { %1862 = vmatpush.bf16.msra.mxu2 %v2912_v28  ;;  %v2993_v30 = vld [vmem:[%s3918_s18 + $0x2f0] sm:$0xf0]  ;;  %v3091_v22 = vld [vmem:[%s3918_s18 + $0x1e4] sm:$0xf]  ;;  %v4790_v46 = vor.u32 %v3011_v3, %v2539_v21  ;;  %v2727_v37 = vld [vmem:[%s3918_s18 + $0xc8] sm:$0xf]  ;;  %v4795_v60 = vor.u32 %v3010_v42, %v2541_v8 }
 0x195   : > { %v2865_v44 = vld [vmem:[%s3918_s18 + $0x1f0] sm:$0xf0]  ;;  %v3058_v34 = vld [vmem:[%s3918_s18 + $0xd4] sm:$0xf0]  ;;  %v2855_v9 = vld [vmem:[%s3918_s18 + $0x1c8] sm:$0xf]  ;;  %v2996_v51 = vor.u32 %v3123_v10, %v2993_v30 }
 0x196   : > { %1775 = vmatpush.bf16.msra.mxu0 %v2640_v6  ;;  %v3090_v13 = vld [vmem:[%s3918_s18 + $0x1d4] sm:$0xf0]  ;;  %v2868_v14 = vor.u32 %v3091_v22, %v2865_v44  ;;  %v2728_v55 = vor.u32 %v3058_v34, %v2727_v37  ;;  %v3119_v18 = vld [vmem:[%s3918_s18 + $0x2c4] sm:$0xf]  ;;  %v2977_v52 = vld [vmem:[%s3918_s18 + $0x2d0] sm:$0xf0] }
 0x197   : > { %1819 = vmatpush.bf16.msra.mxu1 %v2768_v1  ;;  %1907 = vmatpush.bf16.msra.mxu3 %v2644_v20  ;;  %v3087_v17 = vld [vmem:[%s3918_s18 + $0x1c4] sm:$0xf]  ;;  %v2856_v53 = vor.u32 %v3090_v13, %v2855_v9  ;;  %v2849_v25 = vld [vmem:[%s3918_s18 + $0x1d0] sm:$0xf0]  ;;  %v2711_v11 = vld [vmem:[%s3918_s18 + $0xa8] sm:$0xf]  ;;  %v2980_v63 = vor.u32 %v3119_v18, %v2977_v52 }
 0x198   : > { %1863 = vmatpush.bf16.msra.mxu2 %v2896_v49  ;;  %v3054_v31 = vld [vmem:[%s3918_s18 + $0xb4] sm:$0xf0]  ;;  %v2839_v54 = vld [vmem:[%s3918_s18 + $0x1a8] sm:$0xf]  ;;  %v2852_v36 = vor.u32 %v3087_v17, %v2849_v25  ;;  %v3115_v28 = vld [vmem:[%s3918_s18 + $0x2a4] sm:$0xf] }
 0x199   : > { %v3086_v23 = vld [vmem:[%s3918_s18 + $0x1b4] sm:$0xf0]  ;;  %v2712_v62 = vor.u32 %v3054_v31, %v2711_v11  ;;  %v2961_v12 = vld [vmem:[%s3918_s18 + $0x2b0] sm:$0xf0]  ;;  %v3083_v43 = vld [vmem:[%s3918_s18 + $0x1a4] sm:$0xf] }
 0x19a   : > { %1776 = vmatpush.bf16.msra.mxu0 %v2624_v40  ;;  %v2840_v58 = vor.u32 %v3086_v23, %v2839_v54  ;;  %v2833_v57 = vld [vmem:[%s3918_s18 + $0x1b0] sm:$0xf0]  ;;  %v2695_v15 = vld [vmem:[%s3918_s18 + $0x88] sm:$0xf]  ;;  %v3050_v5 = vld [vmem:[%s3918_s18 + $0x94] sm:$0xf0]  ;;  %v2964_v2 = vor.u32 %v3115_v28, %v2961_v12 }
 0x19b   : > { %1820 = vmatpush.bf16.msra.mxu1 %v2752_v0  ;;  %1908 = vmatpush.bf16.msra.mxu3 %v2628_v16  ;;  %v2823_v50 = vld [vmem:[%s3918_s18 + $0x188] sm:$0xf]  ;;  %v3082_v61 = vld [vmem:[%s3918_s18 + $0x194] sm:$0xf0]  ;;  %v2836_v6 = vor.u32 %v3083_v43, %v2833_v57  ;;  %v2696_v47 = vor.u32 %v3050_v5, %v2695_v15  ;;  %v3111_v4 = vld [vmem:[%s3918_s18 + $0x284] sm:$0xf] }
 0x19c   : > { %1864 = vmatpush.bf16.msra.mxu2 %v2880_v26  ;;  %v2945_v27 = vld [vmem:[%s3918_s18 + $0x290] sm:$0xf0]  ;;  %v2824_v1 = vor.u32 %v3082_v61, %v2823_v50  ;;  %v2551_v49 = vld [vmem:[#allocation2 + $0x18] sm:$0xf]  ;;  %v3013_v24 = vld [vmem:[#allocation2 + $0x1c] sm:$0xf] }
 0x19d   : > { %1777 = vmatmul.bf16.vlgmr.msra.gmra.mxu0 %v4790_v46  ;;  %v3014_v48 = vld [vmem:[#allocation2 + $0x20] sm:$0xf0]  ;;  %v2553_v33 = vld [vmem:[#allocation2 + $0x24] sm:$0xf0]  ;;  %v2559_v20 = vld [vmem:[#allocation2 + $0x20] sm:$0xf]  ;;  %v2948_v45 = vor.u32 %v3111_v4, %v2945_v27 }
 0x19e   : > { %1821 = vmatmul.bf16.vlgmr.msra.gmra.mxu1 %v4795_v60  ;;  %1909 = vmatmul.bf16.vlgmr.msra.gmra.mxu3 %v4790_v46  ;;  %v3015_v39 = vld [vmem:[#allocation2 + $0x28] sm:$0xf0]  ;;  %v4823_v21 = vor.u32 %v3014_v48, %v2551_v49  ;;  %v4825_v3 = vor.u32 %v3013_v24, %v2553_v33  ;;  %v3079_v56 = vld [vmem:[%s3918_s18 + $0x184] sm:$0xf]  ;;  %v2817_v40 = vld [vmem:[%s3918_s18 + $0x190] sm:$0xf0] }
 0x19f   : > { %2077 = vmatpush.bf16.msrb.mxu3 %v2872_v41  ;;  %1865 = vmatmul.bf16.vlgmr.msra.gmra.mxu2 %v4797_v38  ;;  %v4827_v7 = vor.u32 %v3015_v39, %v2559_v20  ;;  %v2679_v42 = vld [vmem:[%s3918_s18 + $0x68] sm:$0xf]  ;;  %v2820_v32 = vor.u32 %v3079_v56, %v2817_v40  ;;  %v3046_v35 = vld [vmem:[%s3918_s18 + $0x74] sm:$0xf0]  ;;  %v3107_v19 = vld [vmem:[%s3918_s18 + $0x264] sm:$0xf] }
 0x1a0   : > { %2033 = vmatpush.bf16.msrb.mxu2 %v2744_v59  ;;  %1989 = vmatpush.bf16.msrb.mxu1 %v2996_v51  ;;  %v2807_v0 = vld [vmem:[%s3918_s18 + $0x168] sm:$0xf]  ;;  %v3078_v26 = vld [vmem:[%s3918_s18 + $0x174] sm:$0xf0]  ;;  %v2680_v8 = vor.u32 %v3046_v35, %v2679_v42  ;;  %v2929_v16 = vld [vmem:[%s3918_s18 + $0x270] sm:$0xf0] }
 0x1a1   : > { %1945 = vmatpush.bf16.msrb.mxu0 %v2868_v14  ;;  %v2808_v29 = vor.u32 %v3078_v26, %v2807_v0  ;;  %v2932_v59 = vor.u32 %v3107_v19, %v2929_v16  ;;  %v2563_v10 = vld [vmem:[#allocation2 + $0x30] sm:$0xf]  ;;  %v3017_v30 = vld [vmem:[#allocation2 + $0x38] sm:$0xf0]  ;;  %v3016_v22 = vld [vmem:[#allocation2 + $0x34] sm:$0xf] }
 0x1a2   : > { %v2565_v41 = vld [vmem:[#allocation2 + $0x3c] sm:$0xf0]  ;;  %v2571_v44 = vld [vmem:[#allocation2 + $0x38] sm:$0xf]  ;;  %v3018_v37 = vld [vmem:[#allocation2 + $0x40] sm:$0xf0]  ;;  %v4841_v34 = vor.u32 %v3017_v30, %v2563_v10 }
 0x1a3   : > { %2078 = vmatpush.bf16.msrb.mxu3 %v2856_v53  ;;  %v4843_v9 = vor.u32 %v3016_v22, %v2565_v41  ;;  %v4845_v13 = vor.u32 %v3018_v37, %v2571_v44  ;;  %v3075_v51 = vld [vmem:[%s3918_s18 + $0x164] sm:$0xf]  ;;  %v2801_v14 = vld [vmem:[%s3918_s18 + $0x170] sm:$0xf0]  ;;  %v3042_v52 = vld [vmem:[%s3918_s18 + $0x54] sm:$0xf0] }
 0x1a4   : > { %2034 = vmatpush.bf16.msrb.mxu2 %v2728_v55  ;;  %1990 = vmatpush.bf16.msrb.mxu1 %v2980_v63  ;;  %v2663_v55 = vld [vmem:[%s3918_s18 + $0x48] sm:$0xf]  ;;  %v2804_v18 = vor.u32 %v3075_v51, %v2801_v14  ;;  %v3074_v53 = vld [vmem:[%s3918_s18 + $0x154] sm:$0xf0]  ;;  %v3103_v31 = vld [vmem:[%s3918_s18 + $0x244] sm:$0xf] }
 0x1a5   : > { %1946 = vmatpush.bf16.msrb.mxu0 %v2852_v36  ;;  %v2791_v17 = vld [vmem:[%s3918_s18 + $0x148] sm:$0xf]  ;;  %v2664_v25 = vor.u32 %v3042_v52, %v2663_v55  ;;  %v2913_v54 = vld [vmem:[%s3918_s18 + $0x250] sm:$0xf0]  ;;  %v3071_v23 = vld [vmem:[%s3918_s18 + $0x144] sm:$0xf] }
 0x1a6   : > { %v2792_v11 = vor.u32 %v3074_v53, %v2791_v17  ;;  %v2916_v63 = vor.u32 %v3103_v31, %v2913_v54  ;;  %v2785_v36 = vld [vmem:[%s3918_s18 + $0x150] sm:$0xf0]  ;;  %v2575_v28 = vld [vmem:[#allocation2 + $0x48] sm:$0xf]  ;;  %v3020_v12 = vld [vmem:[#allocation2 + $0x50] sm:$0xf0] }
 0x1a7   : > { %2079 = vmatpush.bf16.msrb.mxu3 %v2840_v58  ;;  %v3019_v43 = vld [vmem:[#allocation2 + $0x4c] sm:$0xf]  ;;  %v2577_v58 = vld [vmem:[#allocation2 + $0x54] sm:$0xf0]  ;;  %v2583_v57 = vld [vmem:[#allocation2 + $0x50] sm:$0xf]  ;;  %v4861_v5 = vor.u32 %v3020_v12, %v2575_v28 }
 0x1a8   : > { %2035 = vmatpush.bf16.msrb.mxu2 %v2712_v62  ;;  %1991 = vmatpush.bf16.msrb.mxu1 %v2964_v2  ;;  %v2788_v62 = vor.u32 %v3071_v23, %v2785_v36  ;;  %v3021_v15 = vld [vmem:[#allocation2 + $0x58] sm:$0xf0]  ;;  %v4863_v50 = vor.u32 %v3019_v43, %v2577_v58  ;;  %v2647_v2 = vld [vmem:[%s3918_s18 + $0x28] sm:$0xf]  ;;  %v3070_v27 = vld [vmem:[%s3918_s18 + $0x134] sm:$0xf0] }
 0x1a9   : > { %1947 = vmatpush.bf16.msrb.mxu0 %v2836_v6  ;;  %v4865_v61 = vor.u32 %v3021_v15, %v2583_v57  ;;  %v3038_v6 = vld [vmem:[%s3918_s18 + $0x34] sm:$0xf0]  ;;  %v2897_v49 = vld [vmem:[%s3918_s18 + $0x230] sm:$0xf0]  ;;  %v3067_v33 = vld [vmem:[%s3918_s18 + $0x124] sm:$0xf] }
 0x1aa   : > { %v2648_v4 = vor.u32 %v3038_v6, %v2647_v2  ;;  %v2769_v20 = vld [vmem:[%s3918_s18 + $0x130] sm:$0xf0]  ;;  %v3023_v56 = vld [vmem:[#allocation2 + $0x68] sm:$0xf0]  ;;  %v2589_v42 = vld [vmem:[#allocation2 + $0x6c] sm:$0xf0] }
 0x1ab   : > { %2080 = vmatpush.bf16.msrb.mxu3 %v2824_v1  ;;  %v3099_v1 = vld [vmem:[%s3918_s18 + $0x224] sm:$0xf]  ;;  %v2772_v39 = vor.u32 %v3067_v33, %v2769_v20  ;;  %v3022_v40 = vld [vmem:[#allocation2 + $0x64] sm:$0xf]  ;;  %v3034_v19 = vld [vmem:[%s3918_s18 + $0x14] sm:$0xf0] }
 0x1ac   : > { %2036 = vmatpush.bf16.msrb.mxu2 %v2696_v47  ;;  %1992 = vmatpush.bf16.msrb.mxu1 %v2948_v45  ;;  %v2775_v47 = vld [vmem:[%s3918_s18 + $0x128] sm:$0xf]  ;;  %v2900_v24 = vor.u32 %v3099_v1, %v2897_v49  ;;  %v2587_v45 = vld [vmem:[#allocation2 + $0x60] sm:$0xf]  ;;  %v3024_v35 = vld [vmem:[#allocation2 + $0x70] sm:$0xf0]  ;;  %v4881_v26 = vor.u32 %v3022_v40, %v2589_v42 }
 0x1ad   : > { %1782 = vmatmul.bf16.gmra.mxu0 %v4823_v21  ;;  %v2776_v48 = vor.u32 %v3070_v27, %v2775_v47  ;;  %v4879_v0 = vor.u32 %v3023_v56, %v2587_v45  ;;  %v2759_v16 = vld [vmem:[%s3918_s18 + $0x108] sm:$0xf]  ;;  %v3066_v10 = vld [vmem:[%s3918_s18 + $0x114] sm:$0xf0]  ;;  %v3095_v30 = vld [vmem:[%s3918_s18 + $0x204] sm:$0xf] }
 0x1ae   : > { %1826 = vmatmul.bf16.gmra.mxu1 %v4825_v3  ;;  %1914 = vmatmul.bf16.gmra.mxu3 %v4823_v21  ;;  %v2881_v22 = vld [vmem:[%s3918_s18 + $0x210] sm:$0xf0]  ;;  %v2760_v41 = vor.u32 %v3066_v10, %v2759_v16  ;;  %v3063_v37 = vld [vmem:[%s3918_s18 + $0x104] sm:$0xf]  ;;  %v2599_v55 = vld [vmem:[#allocation2 + $0x78] sm:$0xf] }
 0x1af   : > { %1870 = vmatmul.bf16.gmra.mxu2 %v4827_v7  ;;  %1948 = vmatpush.bf16.msrb.mxu0 %v2820_v32  ;;  %v2595_v32 = vld [vmem:[#allocation2 + $0x68] sm:$0xf]  ;;  %v2884_v44 = vor.u32 %v3095_v30, %v2881_v22  ;;  %v2753_v51 = vld [vmem:[%s3918_s18 + $0x110] sm:$0xf0]  ;;  %v3025_v52 = vld [vmem:[#allocation2 + $0x7c] sm:$0xf] }
 0x1b0   : > { %2037 = vmatpush.bf16.msrb.mxu2 %v2680_v8  ;;  %2081 = vmatpush.bf16.msrb.mxu3 %v2808_v29  ;;  %v4883_v8 = vor.u32 %v3024_v35, %v2595_v32  ;;  %v2631_v29 = vld [vmem:[%s3918_s18 + $0x8] sm:$0xf]  ;;  %v2756_v14 = vor.u32 %v3063_v37, %v2753_v51  ;;  %v2601_v17 = vld [vmem:[#allocation2 + $0x84] sm:$0xf0]  ;;  %v2607_v53 = vld [vmem:[#allocation2 + $0x80] sm:$0xf] }
 0x1b1   : > { %1993 = vmatpush.bf16.msrb.mxu1 %v2932_v59  ;;  %v2632_v59 = vor.u32 %v3034_v19, %v2631_v29  ;;  %v4899_v31 = vor.u32 %v3025_v52, %v2601_v17  ;;  %v3092_v23 = vld [vmem:[%s3918_s18 + $0x1ec] sm:$0xf]  ;;  %v3001_v28 = vld [vmem:[%s3918_s18 + $0x2f8] sm:$0xf0]  ;;  %v2999_v15 = vld [vmem:[%s3918_s18 + $0x2e8] sm:$0xf] }
 0x1b2   : > { %v3124_v36 = vld [vmem:[%s3918_s18 + $0x2ec] sm:$0xf]  ;;  %v2745_v43 = vld [vmem:[%s3918_s18 + $0xf8] sm:$0xf0]  ;;  %v3126_v2 = vld [vmem:[%s3918_s18 + $0x2f4] sm:$0xf0] }
 0x1b3   : > { %1949 = vmatpush.bf16.msrb.mxu0 %v2804_v18  ;;  %v3026_v18 = vld [vmem:[#allocation2 + $0x80] sm:$0xf0]  ;;  %v3060_v12 = vld [vmem:[%s3918_s18 + $0xec] sm:$0xf]  ;;  %v3004_v58 = vor.u32 %v3124_v36, %v3001_v28  ;;  %v3000_v6 = vor.u32 %v3126_v2, %v2999_v15  ;;  %v2611_v47 = vld [vmem:[#allocation2 + $0x90] sm:$0xf] }
 0x1b4   : > { %2038 = vmatpush.bf16.msrb.mxu2 %v2664_v25  ;;  %2082 = vmatpush.bf16.msrb.mxu3 %v2792_v11  ;;  %v3027_v25 = vld [vmem:[#allocation2 + $0x88] sm:$0xf0]  ;;  %v4897_v11 = vor.u32 %v3026_v18, %v2599_v55  ;;  %v2748_v57 = vor.u32 %v3060_v12, %v2745_v43  ;;  %v3028_v27 = vld [vmem:[#allocation2 + $0x94] sm:$0xf]  ;;  %v2613_v1 = vld [vmem:[#allocation2 + $0x9c] sm:$0xf0] }
 0x1b5   : > { %1994 = vmatpush.bf16.msrb.mxu1 %v2916_v63  ;;  %v4901_v54 = vor.u32 %v3027_v25, %v2607_v53  ;;  %v2873_v63 = vld [vmem:[%s3918_s18 + $0x1f8] sm:$0xf0]  ;;  %v2619_v49 = vld [vmem:[#allocation2 + $0x98] sm:$0xf]  ;;  %v4917_v33 = vor.u32 %v3028_v27, %v2613_v1  ;;  %v3120_v40 = vld [vmem:[%s3918_s18 + $0x2cc] sm:$0xf] }
 0x1b6   : > { %v2857_v45 = vld [vmem:[%s3918_s18 + $0x1d8] sm:$0xf0]  ;;  %v3056_v32 = vld [vmem:[%s3918_s18 + $0xcc] sm:$0xf]  ;;  %v2983_v16 = vld [vmem:[%s3918_s18 + $0x2c8] sm:$0xf] }
 0x1b7   : > { %1950 = vmatpush.bf16.msrb.mxu0 %v2788_v62  ;;  %v2876_v62 = vor.u32 %v3092_v23, %v2873_v63  ;;  %v2985_v42 = vld [vmem:[%s3918_s18 + $0x2d8] sm:$0xf0]  ;;  %v3084_v30 = vld [vmem:[%s3918_s18 + $0x1ac] sm:$0xf]  ;;  %v4945_v52 = vld [vmem:[%s329_s1] sm:$0xf] }
 0x1b8   : > { %2039 = vmatpush.bf16.msrb.mxu2 %v2648_v4  ;;  %2083 = vmatpush.bf16.msrb.mxu3 %v2776_v48  ;;  %v3029_v4 = vld [vmem:[#allocation2 + $0x98] sm:$0xf0]  ;;  %v3030_v48 = vld [vmem:[#allocation2 + $0xa0] sm:$0xf0]  ;;  %v2988_v35 = vor.u32 %v3120_v40, %v2985_v42  ;;  %v2729_v29 = vld [vmem:[%s3918_s18 + $0xd8] sm:$0xf0] }
 0x1b9   : > { %1995 = vmatpush.bf16.msrb.mxu1 %v2900_v24  ;;  %v4915_v24 = vor.u32 %v3029_v4, %v2611_v47  ;;  %v4919_v20 = vor.u32 %v3030_v48, %v2619_v49  ;;  %v2732_v19 = vor.u32 %v3056_v32, %v2729_v29  ;;  %v2841_v22 = vld [vmem:[%s3918_s18 + $0x1b8] sm:$0xf0]  ;;  %v2967_v17 = vld [vmem:[%s3918_s18 + $0x2a8] sm:$0xf]  ;;  %v3118_v53 = vld [vmem:[%s3918_s18 + $0x2b4] sm:$0xf0] }
 0x1ba   : > { %v2969_v37 = vld [vmem:[%s3918_s18 + $0x2b8] sm:$0xf0]  ;;  %v2968_v25 = vor.u32 %v3118_v53, %v2967_v17  ;;  %v3080_v23 = vld [vmem:[%s3918_s18 + $0x18c] sm:$0xf]  ;;  %v2951_v27 = vld [vmem:[%s3918_s18 + $0x288] sm:$0xf] }
 0x1bb   : > { %1951 = vmatpush.bf16.msrb.mxu0 %v2772_v39  ;;  %v3088_v39 = vld [vmem:[%s3918_s18 + $0x1cc] sm:$0xf]  ;;  %v2713_v55 = vld [vmem:[%s3918_s18 + $0xb8] sm:$0xf0]  ;;  %v3114_v1 = vld [vmem:[%s3918_s18 + $0x294] sm:$0xf0] }
 0x1bc   : > { %2040 = vmatpush.bf16.msrb.mxu2 %v2632_v59  ;;  %2084 = vmatpush.bf16.msrb.mxu3 %v2760_v41  ;;  %v2860_v56 = vor.u32 %v3088_v39, %v2857_v45  ;;  %v3122_v59 = vld [vmem:[%s3918_s18 + $0x2d4] sm:$0xf0]  ;;  %v2844_v41 = vor.u32 %v3084_v30, %v2841_v22  ;;  %v2825_v63 = vld [vmem:[%s3918_s18 + $0x198] sm:$0xf0]  ;;  %v3048_v2 = vld [vmem:[%s3918_s18 + $0x8c] sm:$0xf]  ;;  %v2952_v49 = vor.u32 %v3114_v1, %v2951_v27 }
 0x1bd   : > { %1787 = vmatmul.bf16.gmra.mxu0 %v4841_v34  ;;  %1996 = vmatpush.bf16.msrb.mxu1 %v2884_v44  ;;  %v2984_v10 = vor.u32 %v3122_v59, %v2983_v16  ;;  %v3116_v44 = vld [vmem:[%s3918_s18 + $0x2ac] sm:$0xf]  ;;  %v2828_v36 = vor.u32 %v3080_v23, %v2825_v63  ;;  %v2937_v16 = vld [vmem:[%s3918_s18 + $0x278] sm:$0xf0]  ;;  %v2935_v53 = vld [vmem:[%s3918_s18 + $0x268] sm:$0xf] }
 0x1be   : > { %1831 = vmatmul.bf16.gmra.mxu1 %v4843_v9  ;;  %1919 = vmatmul.bf16.gmra.mxu3 %v4841_v34  ;;  %v2972_v51 = vor.u32 %v3116_v44, %v2969_v37  ;;  %v3076_v32 = vld [vmem:[%s3918_s18 + $0x16c] sm:$0xf]  ;;  %v2665_v27 = vld [vmem:[%s3918_s18 + $0x58] sm:$0xf0]  ;;  %s5483_s28 = sld [smem:[#allocation21_spill]]  ;;  %s2369_s22 = sshll.u32 %s3930_s7, 4  ;;  %s2370_s22 = int_to_ptr.vmem [resolvable:$true] %s2369_s22 }
 0x1bf   : > { %1875 = vmatmul.bf16.gmra.mxu2 %v4845_v13  ;;  %1952 = vmatpush.bf16.msrb.mxu0 %v2756_v14  ;;  %v3052_v14 = vld [vmem:[%s3918_s18 + $0xac] sm:$0xf]  ;;  %s5484_s5 = sld [smem:[#allocation20_spill]] }
 0x1c0   : > { %2209 = vmatpush.bf16.msra.mxu2 %v2876_v62  ;;  %2253 = vmatpush.bf16.msra.mxu3 %v3004_v58  ;;  %v2716_v18 = vor.u32 %v3052_v14, %v2713_v55  ;;  %v4952_v62 = vperm.slane %v4945_v52, 0  ;;  %v3112_v58 = vld [vmem:[%s3918_s18 + $0x28c] sm:$0xf]  ;;  %v2681_v55 = vld [vmem:[%s3918_s18 + $0x78] sm:$0xf0]  ;;  %s5486_s15 = sld [smem:[#allocation57_spill]] }
 0x1c1   : > { %2165 = vmatpush.bf16.msra.mxu1 %v2748_v57  ;;  %v2953_v57 = vld [vmem:[%s3918_s18 + $0x298] sm:$0xf0]  ;;  %v3108_v29 = vld [vmem:[%s3918_s18 + $0x26c] sm:$0xf] }
 0x1c2   : > { %v2956_v15 = vor.u32 %v3112_v58, %v2953_v57  ;;  %v2940_v59 = vor.u32 %v3108_v29, %v2937_v16  ;;  %v3044_v14 = vld [vmem:[%s3918_s18 + $0x6c] sm:$0xf]  ;;  %v2919_v29 = vld [vmem:[%s3918_s18 + $0x248] sm:$0xf] }
 0x1c3   : > { %2121 = vmatpush.bf16.msra.mxu0 %v3000_v6  ;;  %v2697_v6 = vld [vmem:[%s3918_s18 + $0x98] sm:$0xf0]  ;;  %v3072_v57 = vld [vmem:[%s3918_s18 + $0x14c] sm:$0xf] }
 0x1c4   : > { %2210 = vmatpush.bf16.msra.mxu2 %v2860_v56  ;;  %2254 = vmatpush.bf16.msra.mxu3 %v2988_v35  ;;  %v2700_v4 = vor.u32 %v3048_v2, %v2697_v6  ;;  %v2809_v35 = vld [vmem:[%s3918_s18 + $0x178] sm:$0xf0]  ;;  %v3104_v2 = vld [vmem:[%s3918_s18 + $0x24c] sm:$0xf]  ;;  %s3177_s19 = smul.u32 168, %s5483_s28 }
 0x1c5   : > { %2166 = vmatpush.bf16.msra.mxu1 %v2732_v19  ;;  %v2812_v19 = vor.u32 %v3076_v32, %v2809_v35  ;;  %s3005_s27 = sshll.u32 %s5484_s5, 2 }
 0x1c6   : > { %s2366_s30 = sadd.s32 %s3177_s19, %s3005_s27  ;;  %s3508_s12 = scalar_lea.hbm %s5486_s15, 2688 }
 0x1c7   : > { %2122 = vmatpush.bf16.msra.mxu0 %v2984_v10  ;;  %s3006_s13 = sshll.u32 %s2366_s30, 3 }
 0x1c8   : > { %2211 = vmatpush.bf16.msra.mxu2 %v2844_v41  ;;  %2255 = vmatpush.bf16.msra.mxu3 %v2972_v51  ;;  %s2368_s24 = scalar_lea.hbm %s5486_s15, %s3006_s13 }
 0x1c9   : > { %2167 = vmatpush.bf16.msra.mxu1 %v2716_v18  ;;  %v2684_v18 = vor.u32 %v3044_v14, %v2681_v55  ;;  %v3068_v14 = vld [vmem:[%s3918_s18 + $0x12c] sm:$0xf]  ;;  %v2777_v55 = vld [vmem:[%s3918_s18 + $0x138] sm:$0xf0]  ;;  %s2371_s14 = sshll.u32 %s2368_s24, 4  ;;  %s2372_s14 = int_to_ptr.hbm [resolvable:$true] %s2371_s14 }
 0x1ca   : > { %s3502_s10 = sshra.s32 %s2372_s14, 4  ;;  %s3503_s10 = int_to_ptr.hbm [resolvable:$true] %s3502_s10 }
 0x1cb   : > { %2123 = vmatpush.bf16.msra.mxu0 %v2968_v25  ;;  %v3110_v25 = vld [vmem:[%s3918_s18 + $0x274] sm:$0xf0]  ;;  %s3504_s3 = scalar_lea.hbm %s3503_s10, 448  ;;  %p3509_p11 = scmp.lt.s32.totalorder %s3503_s10, %s5486_s15 }
 0x1cc   : > { %2212 = vmatpush.bf16.msra.mxu2 %v2828_v36  ;;  %2256 = vmatpush.bf16.msra.mxu3 %v2956_v15  ;;  %v2936_v23 = vor.u32 %v3110_v25, %v2935_v53  ;;  %v2793_v15 = vld [vmem:[%s3918_s18 + $0x158] sm:$0xf0]  ;;  %v3036_v25 = vld [vmem:[%s3918_s18 + $0x2c] sm:$0xf]  ;;  %p3505_p7 = scmp.ne.s32.totalorder %s3503_s10, %s3504_s3  ;;  %p3510_p3 = scmp.lt.s32.totalorder %s3508_s12, %s3504_s3 }
 0x1cd   : > { %1792 = vmatmul.bf16.gmra.mxu0 %v4861_v5  ;;  %2168 = vmatpush.bf16.msra.mxu1 %v2700_v4  ;;  %v2796_v6 = vor.u32 %v3072_v57, %v2793_v15  ;;  %v3040_v4 = vld [vmem:[%s3918_s18 + $0x4c] sm:$0xf]  ;;  %v2905_v53 = vld [vmem:[%s3918_s18 + $0x238] sm:$0xf0] }
 0x1ce   : > { %1836 = vmatmul.bf16.gmra.mxu1 %v4863_v50  ;;  %1924 = vmatmul.bf16.gmra.mxu3 %v4861_v5  ;;  %p3506_p4 = pnand %p3505_p7, %p3786_p12  ;;  %p3511_p8 = por %p3510_p3, %p3509_p11 }
 0x1cf   : > { %1880 = vmatmul.bf16.gmra.mxu2 %v4865_v61  ;;  %2124 = vmatpush.bf16.msra.mxu0 %v2952_v49  ;;  %v2668_v49 = vor.u32 %v3040_v4, %v2665_v27  ;;  %v3102_v4 = vld [vmem:[%s3918_s18 + $0x234] sm:$0xf0] }
 0x1d0   : > { %2213 = vmatpush.bf16.msra.mxu2 %v2812_v19  ;;  %2257 = vmatpush.bf16.msra.mxu3 %v2940_v59  ;;  %v3106_v19 = vld [vmem:[%s3918_s18 + $0x254] sm:$0xf0]  ;;  %p3507_p9 = pneg %p3506_p4 }
 0x1d1   : > { %2169 = vmatpush.bf16.msra.mxu1 %v2684_v18  ;;  %v2920_v59 = vor.u32 %v3106_v19, %v2919_v29  ;;  %v2780_v18 = vor.u32 %v3068_v14, %v2777_v55  ;;  %v3098_v14 = vld [vmem:[%s3918_s18 + $0x214] sm:$0xf0] }
 0x1d2   : > { %p3512_p6 = pnand %p3511_p8, %p3507_p9 }
 0x1d3   : > { %2125 = vmatpush.bf16.msra.mxu0 %v2936_v23 }
 0x1d4   : > { %2214 = vmatpush.bf16.msra.mxu2 %v2796_v6 }
 0x1d5   : > { %2170 = vmatpush.bf16.msra.mxu1 %v2668_v49  ;;  %v3064_v49 = vld [vmem:[%s3918_s18 + $0x10c] sm:$0xf] }
 0x1d7   : > { %2126 = vmatpush.bf16.msra.mxu0 %v2920_v59  ;;  %v2889_v59 = vld [vmem:[%s3918_s18 + $0x218] sm:$0xf0] }
 0x1d8   : > { %2215 = vmatpush.bf16.msra.mxu2 %v2780_v18 }
 0x1dd   : > { %1797 = vmatmul.bf16.gmra.mxu0 %v4879_v0 }
 0x1de   : > { %1841 = vmatmul.bf16.gmra.mxu1 %v4881_v26  ;;  %1929 = vmatmul.bf16.gmra.mxu3 %v4879_v0 }
 0x1df   : > { %1885 = vmatmul.bf16.gmra.mxu2 %v4883_v8 }
 0x1ed   : > { %1802 = vmatmul.bf16.gmra.mxu0 %v4897_v11 }
 0x1ee   : > { %1846 = vmatmul.bf16.gmra.mxu1 %v4899_v31  ;;  %1934 = vmatmul.bf16.gmra.mxu3 %v4897_v11 }
 0x1ef   : > { %1890 = vmatmul.bf16.gmra.mxu2 %v4901_v54 }
 0x1fd   : > { %1807 = vmatmul.bf16.gmra.mxu0 %v4915_v24 }
 0x1fe   : > { %1851 = vmatmul.bf16.gmra.mxu1 %v4917_v33  ;;  %1939 = vmatmul.bf16.gmra.mxu3 %v4915_v24 }
 0x1ff   : > { %1895 = vmatmul.bf16.gmra.mxu2 %v4919_v20 }
 0x20d   : > { %1953 = vmatmul.bf16.vlgmr.msrb.gmra.mxu0 %v4795_v60 }
 0x20e   : > { %1997 = vmatmul.bf16.vlgmr.msrb.gmra.mxu1 %v4797_v38  ;;  %2085 = vmatmul.bf16.vlgmr.msrb.gmra.mxu3 %v4795_v60 }
 0x20f   : > { %2041 = vmatmul.bf16.vlgmr.msrb.gmra.mxu2 %v4790_v46 }
 0x21a   : > { %v1778_v28 = vpop.f32.mrf.mxu0 }
 0x21b   : > { %v1779_v12 = vadd.f32 %v1778_v28, %v4952_v62  ;;  %v1822_v43 = vpop.f32.mrf.mxu1 }
 0x21d   : > { %1958 = vmatmul.bf16.gmra.mxu0 %v4825_v3  ;;  %v1823_v47 = vadd.f32 %v1822_v43, %v1779_v12 }
 0x21e   : > { %2002 = vmatmul.bf16.gmra.mxu1 %v4827_v7  ;;  %2090 = vmatmul.bf16.gmra.mxu3 %v4825_v3 }
 0x21f   : > { %2046 = vmatmul.bf16.gmra.mxu2 %v4823_v21 }
 0x221   : > { %v4965_v45 = vpop.f32.mrf.mxu3 }
 0x222   : > { %v1866_v48 = vpop.f32.mrf.mxu2  ;;  %v1780_v56 = vpop.f32.mrf.mxu0 }
 0x223   : > { %v1867_v39 = vadd.f32 %v1866_v48, %v1823_v47  ;;  %v1824_v40 = vpop.f32.mrf.mxu1  ;;  %v1781_v42 = vadd.f32 %v1780_v56, %v4952_v62  ;;  %v2921_v47 = vld [vmem:[%s3918_s18 + $0x258] sm:$0xf0] }
 0x224   : > { %v2924_v1 = vor.u32 %v3104_v2, %v2921_v47  ;;  %v2903_v47 = vld [vmem:[%s3918_s18 + $0x228] sm:$0xf] }
 0x225   : > { %2297 = vst [vmem:[%s3930_s7] sm:$0xff] %v1867_v39  ;;  %v1825_v10 = vadd.f32 %v1824_v40, %v1781_v42  ;;  %v2904_v27 = vor.u32 %v3102_v4, %v2903_v47 }
 0x226   : > { %2258 = vmatpush.bf16.msra.mxu3 %v2924_v1 }
 0x227   : > { %2127 = vmatpush.bf16.msra.mxu0 %v2904_v27 }
 0x229   : > { %v4973_v41 = vpop.f32.mrf.mxu3 }
 0x22a   : > { %v1868_v30 = vpop.f32.mrf.mxu2  ;;  %v1783_v44 = vpop.f32.mrf.mxu0 }
 0x22b   : > { %v1869_v22 = vadd.f32 %v1868_v30, %v1825_v10  ;;  %v1784_v37 = vadd.f32 %v1783_v44, %v4952_v62  ;;  %v1827_v51 = vpop.f32.mrf.mxu1 }
 0x22d   : > { %2301 = vst [vmem:[%s3930_s7 + $0x20] sm:$0xff] %v1869_v22  ;;  %1963 = vmatmul.bf16.gmra.mxu0 %v4843_v9  ;;  %v1828_v17 = vadd.f32 %v1827_v51, %v1784_v37 }
 0x22e   : > { %2007 = vmatmul.bf16.gmra.mxu1 %v4845_v13  ;;  %2095 = vmatmul.bf16.gmra.mxu3 %v4843_v9 }
 0x22f   : > { %2051 = vmatmul.bf16.gmra.mxu2 %v4841_v34 }
 0x231   : > { %v4985_v28 = vpop.f32.mrf.mxu3 }
 0x232   : > { %v1871_v63 = vpop.f32.mrf.mxu2  ;;  %v1785_v12 = vpop.f32.mrf.mxu0 }
 0x233   : > { %v1872_v36 = vadd.f32 %v1871_v63, %v1828_v17  ;;  %v1829_v43 = vpop.f32.mrf.mxu1  ;;  %v1786_v58 = vadd.f32 %v1785_v12, %v4952_v62  ;;  %v3100_v17 = vld [vmem:[%s3918_s18 + $0x22c] sm:$0xf]  ;;  %v2649_v63 = vld [vmem:[%s3918_s18 + $0x38] sm:$0xf0] }
 0x234   : > { %v2908_v23 = vor.u32 %v3100_v17, %v2905_v53 }
 0x235   : > { %2305 = vst [vmem:[%s3930_s7 + $0x40] sm:$0xff] %v1872_v36  ;;  %v1830_v48 = vadd.f32 %v1829_v43, %v1786_v58  ;;  %v2652_v36 = vor.u32 %v3036_v25, %v2649_v63 }
 0x236   : > { %2259 = vmatpush.bf16.msra.mxu3 %v2908_v23 }
 0x237   : > { %2171 = vmatpush.bf16.msra.mxu1 %v2652_v36 }
 0x239   : > { %v4995_v40 = vpop.f32.mrf.mxu3 }
 0x23a   : > { %v1873_v39 = vpop.f32.mrf.mxu2  ;;  %v1788_v42 = vpop.f32.mrf.mxu0 }
 0x23b   : > { %v1874_v56 = vadd.f32 %v1873_v39, %v1830_v48  ;;  %v1789_v32 = vadd.f32 %v1788_v42, %v4952_v62  ;;  %v1832_v35 = vpop.f32.mrf.mxu1  ;;  %v2761_v48 = vld [vmem:[%s3918_s18 + $0x118] sm:$0xf0] }
 0x23c   : > { %v2764_v39 = vor.u32 %v3064_v49, %v2761_v48 }
 0x23d   : > { %2309 = vst [vmem:[%s3930_s7 + $0x60] sm:$0xff] %v1874_v56  ;;  %1968 = vmatmul.bf16.gmra.mxu0 %v4863_v50  ;;  %v1833_v16 = vadd.f32 %v1832_v35, %v1789_v32 }
 0x23e   : > { %2012 = vmatmul.bf16.gmra.mxu1 %v4865_v61  ;;  %2100 = vmatmul.bf16.gmra.mxu3 %v4863_v50 }
 0x23f   : > { %2056 = vmatmul.bf16.gmra.mxu2 %v4861_v5 }
 0x240   : > { %2216 = vmatpush.bf16.msra.mxu2 %v2764_v39 }
 0x241   : > { %v5005_v22 = vpop.f32.mrf.mxu3 }
 0x242   : > { %v1876_v10 = vpop.f32.mrf.mxu2  ;;  %v1790_v44 = vpop.f32.mrf.mxu0 }
 0x243   : > { %v1877_v30 = vadd.f32 %v1876_v10, %v1833_v16  ;;  %v1834_v37 = vpop.f32.mrf.mxu1  ;;  %v1791_v51 = vadd.f32 %v1790_v44, %v4952_v62  ;;  %v3096_v16 = vld [vmem:[%s3918_s18 + $0x20c] sm:$0xf]  ;;  %v2633_v44 = vld [vmem:[%s3918_s18 + $0x18] sm:$0xf0] }
 0x244   : > { %v2892_v10 = vor.u32 %v3096_v16, %v2889_v59 }
 0x245   : > { %2313 = vst [vmem:[%s3930_s7 + $0x80] sm:$0xff] %v1877_v30  ;;  %v1835_v12 = vadd.f32 %v1834_v37, %v1791_v51  ;;  %v3032_v30 = vld [vmem:[%s3918_s18 + $0xc] sm:$0xf]  ;;  %v2887_v37 = vld [vmem:[%s3918_s18 + $0x208] sm:$0xf]  ;;  %s2354_s18 = scalar_lea.sflag [#allocation5], %s364_s8 }
 0x246   : > { %v2636_v51 = vor.u32 %v3032_v30, %v2633_v44  ;;  %2260 = vmatpush.bf16.msra.mxu3 %v2892_v10  ;;  %v2888_v55 = vor.u32 %v3098_v14, %v2887_v37 }
 0x248   : > { %2172 = vmatpush.bf16.msra.mxu1 %v2636_v51  ;;  %2128 = vmatpush.bf16.msra.mxu0 %v2888_v55 }
 0x249   : > { %v5015_v57 = vpop.f32.mrf.mxu3 }
 0x24a   : > { %v1878_v43 = vpop.f32.mrf.mxu2  ;;  %v1793_v15 = vpop.f32.mrf.mxu0 }
 0x24b   : > { %v1879_v58 = vadd.f32 %v1878_v43, %v1835_v12  ;;  %v1794_v2 = vadd.f32 %v1793_v15, %v4952_v62  ;;  %v1837_v6 = vpop.f32.mrf.mxu1 }
 0x24d   : > { %2317 = vst [vmem:[%s3930_s7 + $0xa0] sm:$0xff] %v1879_v58  ;;  %1973 = vmatmul.bf16.gmra.mxu0 %v4881_v26  ;;  %v1838_v1 = vadd.f32 %v1837_v6, %v1794_v2 }
 0x24e   : > { %2017 = vmatmul.bf16.gmra.mxu1 %v4883_v8  ;;  %2105 = vmatmul.bf16.gmra.mxu3 %v4881_v26 }
 0x24f   : > { %2061 = vmatmul.bf16.gmra.mxu2 %v4879_v0 }
 0x251   : > { %v5027_v32 = vpop.f32.mrf.mxu3 }
 0x252   : > { %v1881_v56 = vpop.f32.mrf.mxu2  ;;  %v1795_v35 = vpop.f32.mrf.mxu0 }
 0x253   : > { %v1882_v42 = vadd.f32 %v1881_v56, %v1838_v1  ;;  %v1839_v29 = vpop.f32.mrf.mxu1  ;;  %v1796_v19 = vadd.f32 %v1795_v35, %v4952_v62 }
 0x255   : > { %2321 = vst [vmem:[%s3930_s7 + $0xc0] sm:$0xff] %v1882_v42  ;;  %v1840_v18 = vadd.f32 %v1839_v29, %v1796_v19 }
 0x259   : > { %v5037_v25 = vpop.f32.mrf.mxu3 }
 0x25a   : > { %v1883_v17 = vpop.f32.mrf.mxu2  ;;  %v1798_v23 = vpop.f32.mrf.mxu0 }
 0x25b   : > { %v1884_v53 = vadd.f32 %v1883_v17, %v1840_v18  ;;  %v1799_v63 = vadd.f32 %v1798_v23, %v4952_v62  ;;  %v1842_v36 = vpop.f32.mrf.mxu1 }
 0x25d   : > { %2325 = vst [vmem:[%s3930_s7 + $0xe0] sm:$0xff] %v1884_v53  ;;  %1978 = vmatmul.bf16.gmra.mxu0 %v4899_v31  ;;  %v1843_v12 = vadd.f32 %v1842_v36, %v1799_v63 }
 0x25e   : > { %2022 = vmatmul.bf16.gmra.mxu1 %v4901_v54  ;;  %2110 = vmatmul.bf16.gmra.mxu3 %v4899_v31 }
 0x25f   : > { %2066 = vmatmul.bf16.gmra.mxu2 %v4897_v11 }
 0x261   : > { %v5045_v15 = vpop.f32.mrf.mxu3 }
 0x262   : > { %v1886_v43 = vpop.f32.mrf.mxu2  ;;  %v1800_v2 = vpop.f32.mrf.mxu0 }
 0x263   : > { %v1887_v58 = vadd.f32 %v1886_v43, %v1843_v12  ;;  %v1844_v6 = vpop.f32.mrf.mxu1  ;;  %v1801_v47 = vadd.f32 %v1800_v2, %v4952_v62 }
 0x265   : > { %2329 = vst [vmem:[%s3930_s7 + $0x100] sm:$0xff] %v1887_v58  ;;  %v1845_v4 = vadd.f32 %v1844_v6, %v1801_v47  ;;  %v5074_v58 = vperm.slane %v4945_v52, 1 }
 0x269   : > { %v5049_v49 = vpop.f32.mrf.mxu3 }
 0x26a   : > { %v1888_v27 = vpop.f32.mrf.mxu2  ;;  %v1803_v48 = vpop.f32.mrf.mxu0 }
 0x26b   : > { %v1889_v1 = vadd.f32 %v1888_v27, %v1845_v4  ;;  %v1804_v39 = vadd.f32 %v1803_v48, %v4952_v62  ;;  %v1847_v56 = vpop.f32.mrf.mxu1 }
 0x26d   : > { %2333 = vst [vmem:[%s3930_s7 + $0x120] sm:$0xff] %v1889_v1  ;;  %1983 = vmatmul.bf16.gmra.mxu0 %v4917_v33  ;;  %v1848_v42 = vadd.f32 %v1847_v56, %v1804_v39 }
 0x26e   : > { %2027 = vmatmul.bf16.gmra.mxu1 %v4919_v20  ;;  %2115 = vmatmul.bf16.gmra.mxu3 %v4917_v33 }
 0x26f   : > { %2071 = vmatmul.bf16.gmra.mxu2 %v4915_v24 }
 0x271   : > { %v5057_v19 = vpop.f32.mrf.mxu3 }
 0x272   : > { %v1891_v35 = vpop.f32.mrf.mxu2  ;;  %v1805_v16 = vpop.f32.mrf.mxu0 }
 0x273   : > { %v1892_v29 = vadd.f32 %v1891_v35, %v1848_v42  ;;  %v1849_v59 = vpop.f32.mrf.mxu1  ;;  %v1806_v10 = vadd.f32 %v1805_v16, %v4952_v62  ;;  %v1916_v16 = vadd.f32 %v4985_v28, %v5074_v58  ;;  %v1918_v28 = vadd.f32 %v4995_v40, %v5074_v58 }
 0x275   : > { %2337 = vst [vmem:[%s3930_s7 + $0x140] sm:$0xff] %v1892_v29  ;;  %v1850_v30 = vadd.f32 %v1849_v59, %v1806_v10 }
 0x279   : > { %v5061_v51 = vpop.f32.mrf.mxu3 }
 0x27a   : > { %v1893_v44 = vpop.f32.mrf.mxu2  ;;  %v1808_v14 = vpop.f32.mrf.mxu0 }
 0x27b   : > { %v1894_v37 = vadd.f32 %v1893_v44, %v1850_v30  ;;  %v1809_v55 = vadd.f32 %v1808_v14, %v4952_v62  ;;  %v1852_v18 = vpop.f32.mrf.mxu1 }
 0x27d   : > { %2341 = vst [vmem:[%s3930_s7 + $0x160] sm:$0xff] %v1894_v37  ;;  %2129 = vmatmul.bf16.vlgmr.msra.gmra.mxu0 %v4797_v38  ;;  %v1853_v17 = vadd.f32 %v1852_v18, %v1809_v55 }
 0x27e   : > { %2173 = vmatmul.bf16.vlgmr.msra.gmra.mxu1 %v4790_v46  ;;  %2261 = vmatmul.bf16.vlgmr.msra.gmra.mxu3 %v4797_v38  ;;  %v1911_v46 = vadd.f32 %v4965_v45, %v5074_v58  ;;  %v1913_v45 = vadd.f32 %v4973_v41, %v5074_v58 }
 0x27f   : > { %2217 = vmatmul.bf16.vlgmr.msra.gmra.mxu2 %v4795_v60 }
 0x281   : > { %v5069_v63 = vpop.f32.mrf.mxu3 }
 0x282   : > { %v1896_v53 = vpop.f32.mrf.mxu2  ;;  %v1810_v36 = vpop.f32.mrf.mxu0 }
 0x283   : > { %v1897_v23 = vadd.f32 %v1896_v53, %v1853_v17  ;;  %v1854_v12 = vpop.f32.mrf.mxu1  ;;  %v1811_v43 = vadd.f32 %v1810_v36, %v4952_v62  ;;  %v5085_v62 = vperm.slane %v4945_v52, 2 }
 0x285   : > { %2345 = vst [vmem:[%s3930_s7 + $0x180] sm:$0xff] %v1897_v23  ;;  %v1855_v2 = vadd.f32 %v1854_v12, %v1811_v43 }
 0x289   : > { %v5078_v6 = vpop.f32.mrf.mxu3 }
 0x28a   : > { %v1898_v60 = vpop.f32.mrf.mxu2  ;;  %v1954_v47 = vpop.f32.mrf.mxu0 }
 0x28b   : > { %v1899_v38 = vadd.f32 %v1898_v60, %v1855_v2  ;;  %v1955_v4 = vadd.f32 %v1954_v47, %v1911_v46  ;;  %v1998_v27 = vpop.f32.mrf.mxu1 }
 0x28d   : > { %2349 = vst [vmem:[%s3930_s7 + $0x1a0] sm:$0xff] %v1899_v38  ;;  %v1999_v1 = vadd.f32 %v1998_v27, %v1955_v4  ;;  %2134 = vmatmul.bf16.gmra.mxu0 %v4827_v7 }
 0x28e   : > { %2178 = vmatmul.bf16.gmra.mxu1 %v4823_v21  ;;  %2266 = vmatmul.bf16.gmra.mxu3 %v4827_v7 }
 0x28f   : > { %2222 = vmatmul.bf16.gmra.mxu2 %v4825_v3  ;;  %2298 = vst [vmem:[%s3930_s7 + $0x8] sm:$0xff] %v1999_v1 }
 0x291   : > { %v2086_v56 = vpop.f32.mrf.mxu3 }
 0x292   : > { %v2042_v48 = vpop.f32.mrf.mxu2  ;;  %v1956_v42 = vpop.f32.mrf.mxu0 }
 0x293   : > { %v2043_v39 = vadd.f32 %v2042_v48, %v5085_v62  ;;  %v1957_v35 = vadd.f32 %v1956_v42, %v1913_v45  ;;  %v2000_v29 = vpop.f32.mrf.mxu1 }
 0x295   : > { %v5092_v21 = vadd.f32 %v2086_v56, %v2043_v39  ;;  %v2001_v3 = vadd.f32 %v2000_v29, %v1957_v35 }
 0x297   : > { %2302 = vst [vmem:[%s3930_s7 + $0x28] sm:$0xff] %v2001_v3 }
 0x299   : > { %v2088_v10 = vpop.f32.mrf.mxu3 }
 0x29a   : > { %v2044_v59 = vpop.f32.mrf.mxu2  ;;  %v1959_v41 = vpop.f32.mrf.mxu0 }
 0x29b   : > { %v2045_v7 = vadd.f32 %v2044_v59, %v5085_v62  ;;  %v1960_v30 = vadd.f32 %v1959_v41, %v1916_v16  ;;  %v2003_v44 = vpop.f32.mrf.mxu1 }
 0x29d   : > { %v5098_v37 = vadd.f32 %v2088_v10, %v2045_v7  ;;  %v2004_v14 = vadd.f32 %v2003_v44, %v1960_v30  ;;  %2139 = vmatmul.bf16.gmra.mxu0 %v4845_v13 }
 0x29e   : > { %2183 = vmatmul.bf16.gmra.mxu1 %v4841_v34  ;;  %2271 = vmatmul.bf16.gmra.mxu3 %v4845_v13  ;;  %v1921_v34 = vadd.f32 %v5005_v22, %v5074_v58  ;;  %v1923_v22 = vadd.f32 %v5015_v57, %v5074_v58 }
 0x29f   : > { %2227 = vmatmul.bf16.gmra.mxu2 %v4843_v9  ;;  %2306 = vst [vmem:[%s3930_s7 + $0x48] sm:$0xff] %v2004_v14 }
 0x2a1   : > { %v2091_v17 = vpop.f32.mrf.mxu3 }
 0x2a2   : > { %v2047_v55 = vpop.f32.mrf.mxu2  ;;  %v1961_v53 = vpop.f32.mrf.mxu0 }
 0x2a3   : > { %v2048_v18 = vadd.f32 %v2047_v55, %v5085_v62  ;;  %v1962_v23 = vadd.f32 %v1961_v53, %v1918_v28  ;;  %v2005_v36 = vpop.f32.mrf.mxu1 }
 0x2a5   : > { %v5108_v12 = vadd.f32 %v2091_v17, %v2048_v18  ;;  %v2006_v43 = vadd.f32 %v2005_v36, %v1962_v23 }
 0x2a7   : > { %2310 = vst [vmem:[%s3930_s7 + $0x68] sm:$0xff] %v2006_v43 }
 0x2a9   : > { %v2093_v2 = vpop.f32.mrf.mxu3 }
 0x2aa   : > { %v2049_v9 = vpop.f32.mrf.mxu2  ;;  %v1964_v40 = vpop.f32.mrf.mxu0 }
 0x2ab   : > { %v2050_v13 = vadd.f32 %v2049_v9, %v5085_v62  ;;  %v1965_v46 = vadd.f32 %v1964_v40, %v1921_v34  ;;  %v2008_v60 = vpop.f32.mrf.mxu1 }
 0x2ad   : > { %v5114_v38 = vadd.f32 %v2093_v2, %v2050_v13  ;;  %v2009_v47 = vadd.f32 %v2008_v60, %v1965_v46  ;;  %2144 = vmatmul.bf16.gmra.mxu0 %v4865_v61 }
 0x2ae   : > { %2188 = vmatmul.bf16.gmra.mxu1 %v4861_v5  ;;  %2276 = vmatmul.bf16.gmra.mxu3 %v4865_v61  ;;  %v1926_v5 = vadd.f32 %v5027_v32, %v5074_v58  ;;  %v1928_v32 = vadd.f32 %v5037_v25, %v5074_v58 }
 0x2af   : > { %2232 = vmatmul.bf16.gmra.mxu2 %v4863_v50  ;;  %2314 = vst [vmem:[%s3930_s7 + $0x88] sm:$0xff] %v2009_v47 }
 0x2b1   : > { %v2096_v1 = vpop.f32.mrf.mxu3 }
 0x2b2   : > { %v2052_v4 = vpop.f32.mrf.mxu2  ;;  %v1966_v45 = vpop.f32.mrf.mxu0 }
 0x2b3   : > { %v2053_v27 = vadd.f32 %v2052_v4, %v5085_v62  ;;  %v1967_v48 = vadd.f32 %v1966_v45, %v1923_v22  ;;  %v2010_v39 = vpop.f32.mrf.mxu1 }
 0x2b5   : > { %v5124_v56 = vadd.f32 %v2096_v1, %v2053_v27  ;;  %v2011_v42 = vadd.f32 %v2010_v39, %v1967_v48 }
 0x2b7   : > { %2318 = vst [vmem:[%s3930_s7 + $0xa8] sm:$0xff] %v2011_v42 }
 0x2b9   : > { %v2098_v35 = vpop.f32.mrf.mxu3 }
 0x2ba   : > { %v2054_v50 = vpop.f32.mrf.mxu2  ;;  %v1969_v57 = vpop.f32.mrf.mxu0 }
 0x2bb   : > { %v2055_v61 = vadd.f32 %v2054_v50, %v5085_v62  ;;  %v1970_v29 = vadd.f32 %v1969_v57, %v1926_v5  ;;  %v2013_v3 = vpop.f32.mrf.mxu1 }
 0x2bd   : > { %v5130_v16 = vadd.f32 %v2098_v35, %v2055_v61  ;;  %v2014_v59 = vadd.f32 %v2013_v3, %v1970_v29  ;;  %2149 = vmatmul.bf16.gmra.mxu0 %v4883_v8 }
 0x2be   : > { %2193 = vmatmul.bf16.gmra.mxu1 %v4879_v0  ;;  %2281 = vmatmul.bf16.gmra.mxu3 %v4883_v8  ;;  %v1931_v0 = vadd.f32 %v5045_v15, %v5074_v58  ;;  %v1933_v15 = vadd.f32 %v5049_v49, %v5074_v58 }
 0x2bf   : > { %2237 = vmatmul.bf16.gmra.mxu2 %v4881_v26  ;;  %2322 = vst [vmem:[%s3930_s7 + $0xc8] sm:$0xff] %v2014_v59 }
 0x2c1   : > { %v2101_v41 = vpop.f32.mrf.mxu3 }
 0x2c2   : > { %v2057_v7 = vpop.f32.mrf.mxu2  ;;  %v1971_v30 = vpop.f32.mrf.mxu0 }
 0x2c3   : > { %v2058_v10 = vadd.f32 %v2057_v7, %v5085_v62  ;;  %v1972_v44 = vadd.f32 %v1971_v30, %v1928_v32  ;;  %v2015_v14 = vpop.f32.mrf.mxu1  ;;  %v1943_v7 = vadd.f32 %v5078_v6, %v5074_v58 }
 0x2c5   : > { %v5140_v28 = vadd.f32 %v2101_v41, %v2058_v10  ;;  %v2016_v55 = vadd.f32 %v2015_v14, %v1972_v44 }
 0x2c7   : > { %2326 = vst [vmem:[%s3930_s7 + $0xe8] sm:$0xff] %v2016_v55 }
 0x2c9   : > { %v2103_v18 = vpop.f32.mrf.mxu3 }
 0x2ca   : > { %v2059_v26 = vpop.f32.mrf.mxu2  ;;  %v1974_v25 = vpop.f32.mrf.mxu0 }
 0x2cb   : > { %v2060_v8 = vadd.f32 %v2059_v26, %v5085_v62  ;;  %v1975_v17 = vadd.f32 %v1974_v25, %v1931_v0  ;;  %v2018_v53 = vpop.f32.mrf.mxu1 }
 0x2cd   : > { %v5146_v23 = vadd.f32 %v2103_v18, %v2060_v8  ;;  %v2019_v36 = vadd.f32 %v2018_v53, %v1975_v17  ;;  %2154 = vmatmul.bf16.gmra.mxu0 %v4901_v54 }
 0x2ce   : > { %2198 = vmatmul.bf16.gmra.mxu1 %v4897_v11  ;;  %2286 = vmatmul.bf16.gmra.mxu3 %v4901_v54  ;;  %v1936_v11 = vadd.f32 %v5057_v19, %v5074_v58  ;;  %v1938_v19 = vadd.f32 %v5061_v51, %v5074_v58 }
 0x2cf   : > { %2242 = vmatmul.bf16.gmra.mxu2 %v4899_v31  ;;  %2330 = vst [vmem:[%s3930_s7 + $0x108] sm:$0xff] %v2019_v36 }
 0x2d1   : > { %v2106_v9 = vpop.f32.mrf.mxu3 }
 0x2d2   : > { %v2062_v43 = vpop.f32.mrf.mxu2  ;;  %v1976_v13 = vpop.f32.mrf.mxu0 }
 0x2d3   : > { %v2063_v34 = vadd.f32 %v2062_v43, %v5085_v62  ;;  %v1977_v2 = vadd.f32 %v1976_v13, %v1933_v15  ;;  %v2020_v40 = vpop.f32.mrf.mxu1 }
 0x2d5   : > { %v5156_v46 = vadd.f32 %v2106_v9, %v2063_v34  ;;  %v2021_v60 = vadd.f32 %v2020_v40, %v1977_v2 }
 0x2d7   : > { %2334 = vst [vmem:[%s3930_s7 + $0x128] sm:$0xff] %v2021_v60 }
 0x2d9   : > { %v2108_v47 = vpop.f32.mrf.mxu3 }
 0x2da   : > { %v2064_v31 = vpop.f32.mrf.mxu2  ;;  %v1979_v49 = vpop.f32.mrf.mxu0 }
 0x2db   : > { %v2065_v54 = vadd.f32 %v2064_v31, %v5085_v62  ;;  %v1980_v22 = vadd.f32 %v1979_v49, %v1936_v11  ;;  %v2023_v4 = vpop.f32.mrf.mxu1 }
 0x2dd   : > { %v5162_v27 = vadd.f32 %v2108_v47, %v2065_v54  ;;  %v2024_v1 = vadd.f32 %v2023_v4, %v1980_v22  ;;  %2159 = vmatmul.bf16.gmra.mxu0 %v4919_v20 }
 0x2de   : > { %2203 = vmatmul.bf16.gmra.mxu1 %v4915_v24  ;;  %2291 = vmatmul.bf16.gmra.mxu3 %v4919_v20  ;;  %v1941_v24 = vadd.f32 %v5069_v63, %v5074_v58  ;;  %v5189_v58 = vperm.slane %v4945_v52, 3 }
 0x2df   : > { %2247 = vmatmul.bf16.gmra.mxu2 %v4917_v33  ;;  %2338 = vst [vmem:[%s3930_s7 + $0x148] sm:$0xff] %v2024_v1 }
 0x2e1   : > { %v2111_v39 = vpop.f32.mrf.mxu3 }
 0x2e2   : > { %v2067_v45 = vpop.f32.mrf.mxu2  ;;  %v1981_v42 = vpop.f32.mrf.mxu0 }
 0x2e3   : > { %v2068_v48 = vadd.f32 %v2067_v45, %v5085_v62  ;;  %v1982_v5 = vadd.f32 %v1981_v42, %v1938_v19  ;;  %v2025_v50 = vpop.f32.mrf.mxu1 }
 0x2e5   : > { %v5172_v61 = vadd.f32 %v2111_v39, %v2068_v48  ;;  %v2026_v35 = vadd.f32 %v2025_v50, %v1982_v5 }
 0x2e7   : > { %2342 = vst [vmem:[%s3930_s7 + $0x168] sm:$0xff] %v2026_v35 }
 0x2e9   : > { %v2113_v57 = vpop.f32.mrf.mxu3 }
 0x2ea   : > { %v2069_v33 = vpop.f32.mrf.mxu2  ;;  %v1984_v51 = vpop.f32.mrf.mxu0 }
 0x2eb   : > { %v2070_v20 = vadd.f32 %v2069_v33, %v5085_v62  ;;  %v1985_v29 = vadd.f32 %v1984_v51, %v1941_v24  ;;  %v2028_v3 = vpop.f32.mrf.mxu1 }
 0x2ed   : > { %v5178_v59 = vadd.f32 %v2113_v57, %v2070_v20  ;;  %v2029_v32 = vadd.f32 %v2028_v3, %v1985_v29 }
 0x2ef   : > { %2346 = vst [vmem:[%s3930_s7 + $0x188] sm:$0xff] %v2029_v32 }
 0x2f1   : > { %v2116_v63 = vpop.f32.mrf.mxu3 }
 0x2f2   : > { %v2072_v10 = vpop.f32.mrf.mxu2  ;;  %v1986_v30 = vpop.f32.mrf.mxu0 }
 0x2f3   : > { %v2073_v41 = vadd.f32 %v2072_v10, %v5085_v62  ;;  %v1987_v44 = vadd.f32 %v1986_v30, %v1943_v7  ;;  %v2030_v14 = vpop.f32.mrf.mxu1 }
 0x2f5   : > { %v5184_v55 = vadd.f32 %v2116_v63, %v2073_v41  ;;  %v2031_v0 = vadd.f32 %v2030_v14, %v1987_v44 }
 0x2f7   : > { %2350 = vst [vmem:[%s3930_s7 + $0x1a8] sm:$0xff] %v2031_v0 }
 0x2f9   : > { %v2118_v18 = vpop.f32.mrf.mxu3 }
 0x2fa   : > { %v2074_v26 = vpop.f32.mrf.mxu2  ;;  %v2130_v25 = vpop.f32.mrf.mxu0 }
 0x2fb   : > { %v2075_v8 = vadd.f32 %v2074_v26, %v5085_v62  ;;  %v2131_v6 = vadd.f32 %v2130_v25, %v5092_v21  ;;  %v2174_v17 = vpop.f32.mrf.mxu1 }
 0x2fc   : > { %v2175_v36 = vadd.f32 %v2174_v17, %v5189_v58 }
 0x2fd   : > { %v5192_v53 = vadd.f32 %v2118_v18, %v2075_v8  ;;  %2299 = vst [vmem:[%s3930_s7 + $0x10] sm:$0xff] %v2131_v6 }
 0x301   : > { %v2262_v34 = vpop.f32.mrf.mxu3 }
 0x302   : > { %v2218_v15 = vpop.f32.mrf.mxu2  ;;  %v2132_v62 = vpop.f32.mrf.mxu0 }
 0x303   : > { %v2219_v43 = vadd.f32 %v2218_v15, %v2175_v36  ;;  %v2133_v9 = vadd.f32 %v2132_v62, %v5098_v37  ;;  %v2176_v13 = vpop.f32.mrf.mxu1 }
 0x304   : > { %v2177_v52 = vadd.f32 %v2176_v13, %v5189_v58 }
 0x305   : > { %v2263_v2 = vadd.f32 %v2262_v34, %v2219_v43  ;;  %2303 = vst [vmem:[%s3930_s7 + $0x30] sm:$0xff] %v2133_v9 }
 0x307   : > { %2300 = vst [vmem:[%s3930_s7 + $0x18] sm:$0xff] %v2263_v2 }
 0x309   : > { %v2264_v60 = vpop.f32.mrf.mxu3 }
 0x30a   : > { %v2220_v21 = vpop.f32.mrf.mxu2  ;;  %v2135_v11 = vpop.f32.mrf.mxu0 }
 0x30b   : > { %v2221_v40 = vadd.f32 %v2220_v21, %v2177_v52  ;;  %v2136_v31 = vadd.f32 %v2135_v11, %v5108_v12  ;;  %v2179_v54 = vpop.f32.mrf.mxu1 }
 0x30c   : > { %v2180_v37 = vadd.f32 %v2179_v54, %v5189_v58 }
 0x30d   : > { %v2265_v47 = vadd.f32 %v2264_v60, %v2221_v40  ;;  %2307 = vst [vmem:[%s3930_s7 + $0x50] sm:$0xff] %v2136_v31 }
 0x30f   : > { %2304 = vst [vmem:[%s3930_s7 + $0x38] sm:$0xff] %v2265_v47 }
 0x311   : > { %v2267_v4 = vpop.f32.mrf.mxu3 }
 0x312   : > { %v2223_v49 = vpop.f32.mrf.mxu2  ;;  %v2137_v1 = vpop.f32.mrf.mxu0 }
 0x313   : > { %v2224_v22 = vadd.f32 %v2223_v49, %v2180_v37  ;;  %v2138_v19 = vadd.f32 %v2137_v1, %v5114_v38  ;;  %v2181_v45 = vpop.f32.mrf.mxu1 }
 0x314   : > { %v2182_v12 = vadd.f32 %v2181_v45, %v5189_v58 }
 0x315   : > { %v2268_v48 = vadd.f32 %v2267_v4, %v2224_v22  ;;  %2311 = vst [vmem:[%s3930_s7 + $0x70] sm:$0xff] %v2138_v19 }
 0x317   : > { %2308 = vst [vmem:[%s3930_s7 + $0x58] sm:$0xff] %v2268_v48 }
 0x319   : > { %v2269_v5 = vpop.f32.mrf.mxu3 }
 0x31a   : > { %v2225_v39 = vpop.f32.mrf.mxu2  ;;  %v2140_v50 = vpop.f32.mrf.mxu0 }
 0x31b   : > { %v2226_v42 = vadd.f32 %v2225_v39, %v2182_v12  ;;  %v2141_v35 = vadd.f32 %v2140_v50, %v5124_v56  ;;  %v2184_v24 = vpop.f32.mrf.mxu1 }
 0x31c   : > { %v2185_v38 = vadd.f32 %v2184_v24, %v5189_v58 }
 0x31d   : > { %v2270_v33 = vadd.f32 %v2269_v5, %v2226_v42  ;;  %2315 = vst [vmem:[%s3930_s7 + $0x90] sm:$0xff] %v2141_v35 }
 0x31f   : > { %2312 = vst [vmem:[%s3930_s7 + $0x78] sm:$0xff] %v2270_v33 }
 0x321   : > { %v2272_v51 = vpop.f32.mrf.mxu3 }
 0x322   : > { %v2228_v20 = vpop.f32.mrf.mxu2  ;;  %v2142_v29 = vpop.f32.mrf.mxu0 }
 0x323   : > { %v2229_v57 = vadd.f32 %v2228_v20, %v2185_v38  ;;  %v2143_v3 = vadd.f32 %v2142_v29, %v5130_v16  ;;  %v2186_v32 = vpop.f32.mrf.mxu1 }
 0x324   : > { %v2187_v56 = vadd.f32 %v2186_v32, %v5189_v58 }
 0x325   : > { %v2273_v7 = vadd.f32 %v2272_v51, %v2229_v57  ;;  %2319 = vst [vmem:[%s3930_s7 + $0xb0] sm:$0xff] %v2143_v3 }
 0x327   : > { %2316 = vst [vmem:[%s3930_s7 + $0x98] sm:$0xff] %v2273_v7 }
 0x329   : > { %v2274_v63 = vpop.f32.mrf.mxu3 }
 0x32a   : > { %v2230_v10 = vpop.f32.mrf.mxu2  ;;  %v2145_v30 = vpop.f32.mrf.mxu0 }
 0x32b   : > { %v2231_v41 = vadd.f32 %v2230_v10, %v2187_v56  ;;  %v2146_v44 = vadd.f32 %v2145_v30, %v5140_v28  ;;  %v2189_v14 = vpop.f32.mrf.mxu1 }
 0x32c   : > { %v2190_v16 = vadd.f32 %v2189_v14, %v5189_v58 }
 0x32d   : > { %v2275_v0 = vadd.f32 %v2274_v63, %v2231_v41  ;;  %2323 = vst [vmem:[%s3930_s7 + $0xd0] sm:$0xff] %v2146_v44 }
 0x32f   : > { %2320 = vst [vmem:[%s3930_s7 + $0xb8] sm:$0xff] %v2275_v0 }
 0x331   : > { %v2277_v18 = vpop.f32.mrf.mxu3 }
 0x332   : > { %v2233_v26 = vpop.f32.mrf.mxu2  ;;  %v2147_v25 = vpop.f32.mrf.mxu0 }
 0x333   : > { %v2234_v8 = vadd.f32 %v2233_v26, %v2190_v16  ;;  %v2148_v6 = vadd.f32 %v2147_v25, %v5146_v23  ;;  %v2191_v17 = vpop.f32.mrf.mxu1 }
 0x334   : > { %v2192_v28 = vadd.f32 %v2191_v17, %v5189_v58 }
 0x335   : > { %v2278_v36 = vadd.f32 %v2277_v18, %v2234_v8  ;;  %2327 = vst [vmem:[%s3930_s7 + $0xf0] sm:$0xff] %v2148_v6 }
 0x337   : > { %2324 = vst [vmem:[%s3930_s7 + $0xd8] sm:$0xff] %v2278_v36 }
 0x339   : > { %v2279_v34 = vpop.f32.mrf.mxu3 }
 0x33a   : > { %v2235_v15 = vpop.f32.mrf.mxu2  ;;  %v2150_v62 = vpop.f32.mrf.mxu0 }
 0x33b   : > { %v2236_v43 = vadd.f32 %v2235_v15, %v2192_v28  ;;  %v2151_v9 = vadd.f32 %v2150_v62, %v5156_v46  ;;  %v2194_v13 = vpop.f32.mrf.mxu1 }
 0x33c   : > { %v2195_v23 = vadd.f32 %v2194_v13, %v5189_v58 }
 0x33d   : > { %v2280_v2 = vadd.f32 %v2279_v34, %v2236_v43  ;;  %2331 = vst [vmem:[%s3930_s7 + $0x110] sm:$0xff] %v2151_v9 }
 0x33f   : > { %2328 = vst [vmem:[%s3930_s7 + $0xf8] sm:$0xff] %v2280_v2 }
 0x341   : > { %v2282_v40 = vpop.f32.mrf.mxu3 }
 0x342   : > { %v2238_v52 = vpop.f32.mrf.mxu2  ;;  %v2152_v60 = vpop.f32.mrf.mxu0 }
 0x343   : > { %v2239_v21 = vadd.f32 %v2238_v52, %v2195_v23  ;;  %v2153_v11 = vadd.f32 %v2152_v60, %v5162_v27  ;;  %v2196_v31 = vpop.f32.mrf.mxu1 }
 0x344   : > { %v2197_v46 = vadd.f32 %v2196_v31, %v5189_v58 }
 0x345   : > { %v2283_v54 = vadd.f32 %v2282_v40, %v2239_v21  ;;  %2335 = vst [vmem:[%s3930_s7 + $0x130] sm:$0xff] %v2153_v11 }
 0x347   : > { %2332 = vst [vmem:[%s3930_s7 + $0x118] sm:$0xff] %v2283_v54 }
 0x349   : > { %v2284_v49 = vpop.f32.mrf.mxu3 }
 0x34a   : > { %v2240_v47 = vpop.f32.mrf.mxu2  ;;  %v2155_v22 = vpop.f32.mrf.mxu0 }
 0x34b   : > { %v2241_v37 = vadd.f32 %v2240_v47, %v2197_v46  ;;  %v2156_v4 = vadd.f32 %v2155_v22, %v5172_v61  ;;  %v2199_v1 = vpop.f32.mrf.mxu1 }
 0x34c   : > { %v2200_v27 = vadd.f32 %v2199_v1, %v5189_v58 }
 0x34d   : > { %v2285_v19 = vadd.f32 %v2284_v49, %v2241_v37  ;;  %2339 = vst [vmem:[%s3930_s7 + $0x150] sm:$0xff] %v2156_v4 }
 0x34f   : > { %2336 = vst [vmem:[%s3930_s7 + $0x138] sm:$0xff] %v2285_v19 }
 0x351   : > { %v2287_v12 = vpop.f32.mrf.mxu3 }
 0x352   : > { %v2243_v45 = vpop.f32.mrf.mxu2  ;;  %v2157_v39 = vpop.f32.mrf.mxu0 }
 0x353   : > { %v2244_v48 = vadd.f32 %v2243_v45, %v2200_v27  ;;  %v2158_v42 = vadd.f32 %v2157_v39, %v5178_v59  ;;  %v2201_v5 = vpop.f32.mrf.mxu1 }
 0x354   : > { %v2202_v61 = vadd.f32 %v2201_v5, %v5189_v58 }
 0x355   : > { %v2288_v50 = vadd.f32 %v2287_v12, %v2244_v48  ;;  %2343 = vst [vmem:[%s3930_s7 + $0x170] sm:$0xff] %v2158_v42 }
 0x357   : > { %2340 = vst [vmem:[%s3930_s7 + $0x158] sm:$0xff] %v2288_v50 }
 0x359   : > { %v2289_v33 = vpop.f32.mrf.mxu3 }
 0x35a   : > { %v2245_v35 = vpop.f32.mrf.mxu2  ;;  %v2160_v38 = vpop.f32.mrf.mxu0 }
 0x35b   : > { %v2246_v24 = vadd.f32 %v2245_v35, %v2202_v61  ;;  %v2161_v20 = vadd.f32 %v2160_v38, %v5184_v55  ;;  %v2204_v57 = vpop.f32.mrf.mxu1 }
 0x35c   : > { %v2205_v59 = vadd.f32 %v2204_v57, %v5189_v58 }
 0x35d   : > { %v2290_v51 = vadd.f32 %v2289_v33, %v2246_v24  ;;  %2347 = vst [vmem:[%s3930_s7 + $0x190] sm:$0xff] %v2161_v20 }
 0x35f   : > { %2344 = vst [vmem:[%s3930_s7 + $0x178] sm:$0xff] %v2290_v51 }
 0x361   : > { %v2292_v32 = vpop.f32.mrf.mxu3 }
 0x362   : > { %v2248_v29 = vpop.f32.mrf.mxu2  ;;  %v2162_v7 = vpop.f32.mrf.mxu0 }
 0x363   : > { %v2249_v3 = vadd.f32 %v2248_v29, %v2205_v59  ;;  %v2163_v55 = vadd.f32 %v2162_v7, %v5192_v53  ;;  %v2206_v10 = vpop.f32.mrf.mxu1 }
 0x364   : > { %v2207_v41 = vadd.f32 %v2206_v10, %v5189_v58 }
 0x365   : > { %v2293_v56 = vadd.f32 %v2292_v32, %v2249_v3  ;;  %2351 = vst [vmem:[%s3930_s7 + $0x1b0] sm:$0xff] %v2163_v55 }
 0x367   : > { %2348 = vst [vmem:[%s3930_s7 + $0x198] sm:$0xff] %v2293_v56 }
 0x369   : > { %v2294_v44 = vpop.f32.mrf.mxu3 }
 0x36a   : > { %v2250_v63 = vpop.f32.mrf.mxu2 }
 0x36b   : > { %v2251_v30 = vadd.f32 %v2250_v63, %v2207_v41 }
 0x36d   : > { %v2295_v53 = vadd.f32 %v2294_v44, %v2251_v30 }
 0x36f   : > { %2352 = vst [vmem:[%s3930_s7 + $0x1b8] sm:$0xff] %v2295_v53 }
 0x370   : > { %3515 = shalt.err (!%p3512_p6)
}
 0x371   : > { %s3652_s8 = smov 512   ;;  %s3653_s7 = smov 1536  }
 0x372   : > { %s3654_s19 = smov 32  }
 0x373   : > { %3148 = dma.vmem_to_hbm [thread:$0]  (%p3786_p12), %s2370_s22, 7168, %s2372_s14, %s2354_s18, %s3652_s8, %s3653_s7, %s3654_s19  }
 0x374 PF: > { %s5488_s27 = sld [smem:[#allocation23_spill]] }
 0x375   : > { %s5489_s30 = sld [smem:[#allocation17_spill]] }
 0x37a   : > { %p3178_p10 = scmp.ge.s32.totalorder %s5488_s27, 2 }
 0x37b   : > { %s2386_s2 = sand.u32 1, %s5489_s30  }
 0x37c   : > { %p3168_p13 = pnand %p3178_p10, %p3791_p1  ;;  %s2387_s9 = scalar_lea.sflag [#allocation5], %s2386_s2 }
 0x37e   : > { %p3169_p0 = pneg %p3168_p13 }
 0x380   : > { %3585 = dma.done.wait (%p3169_p0), %s2387_s9, 7168  }
 0x381   : > { %3587 = vsyncadd (%p3169_p0), %s2387_s9, 4294960128  ;;  %s25_s6 = sadd.s32 1, %s5488_s27   ;;  %s5492_s18 = sld [smem:[#allocation18_spill]] }
 0x382   : > { %p5272_p2 = scmp.ge.s32.totalorder %s25_s6, 8   ;;  %s5493_s17 = sld [smem:[#allocation19_spill]] }
 0x383   : > { %s5494_s14 = sld [smem:[#allocation28_spill]]  ;;  %s5499_s19 = smov %s3598_s20 }
 0x384   : > { %s5495_s28 = sld [smem:[#allocation22_spill]]  ;;  %s5500_s20 = smov %s3890_s21 }
 0x385   : > { %s5496_s10 = sld [smem:[#allocation27_spill]]  ;;  %s5502_s22 = smov %s3610_s23 }
 0x386   : > { %s5497_s30 = sld [smem:[#allocation29_spill]]  ;;  %s5504_s24 = smov %s3618_s25 }
 0x387   : > { %s5505_s25 = smov %s3622_s26  ;;  %s5506_s26 = smov %s3885_s11 }
 0x388   : > { %s5501_s21 = smov %s5493_s17  ;;  %s5507_s27 = smov %s3634_s29 }
 0x389   : > { %s5503_s23 = smov %s5494_s14  ;;  %24 = sbr.rel (!%p5272_p2) target bundleno = 18 (0x12), region = 121 }
 0x38b   : > { %s5508_s29 = smov %s5496_s10 }
 0x38e   :  { %2393 = vsyncpa [#allocation4], 1 }
 0x38f   :  { %2395 = vsyncpa [#allocation4 + $0x1], 1 }
 0x390   :  { %2396 = vsyncpa [#allocation7], 1 }
 0x391   :  { %2397 = vsyncpa [#allocation10], 1 }
 0x392   :  { %2399 = vsyncpa [#allocation10 + $0x1], 1 }
 0x393   :  { %2400 = vsyncpa [#allocation5], 1 }
 0x394   :  { %2402 = vsyncpa [#allocation5 + $0x1], 1 }

</bundles_post_ra>
